<compile_context>
chip_gen: v7x
topology: tpu7x:2x2x1
jax: 0.10.0
libtpu: 0.0.40
codegen_flags: <defaults>
</compile_context>

<pallas_src>
import functools

import jax
import jax.numpy as jnp
from jax import lax
from jax.experimental import pallas as pl
from jax.experimental.pallas import tpu as pltpu

EPS = 1e-5
LANE = 128


def _vmem_limit_bytes():
    """Generation-aware scoped-VMEM cap (leave ~25% headroom for the compiler)."""
    try:
        cap = pltpu.get_tpu_info().vmem_capacity_bytes
    except Exception:  # no/odd TPU info -> conservative (v7x-sized) assumption
        cap = 64 * 1024 * 1024
    return max(32 * 1024 * 1024, int(cap * 3 // 4))


VMEM_LIMIT = _vmem_limit_bytes()
TILE_TARGET = 1024 if VMEM_LIMIT >= 96 * 1024 * 1024 else 512


# ----------------------------- small helpers --------------------------------

def _round_up(n, m):
    return ((n + m - 1) // m) * m


def _pick_tile(m, target):
    """Row tile: multiple of 8, at most `target`; ragged last tile is allowed."""
    return max(8, min(target, _round_up(m, 8)))


def _pad2d(a, rows, cols):
    return jnp.pad(a, ((0, rows - a.shape[0]), (0, cols - a.shape[1])))


def _pad_vec(v, n):
    return jnp.pad(v, (0, n - v.shape[0])).reshape(1, n).astype(jnp.float32)


def _finalize_stats(partial, count):
    """Combine per-tile (sum, sum_sq) -> (mu, 1/sqrt(var + eps)). Tiny JAX glue."""
    tot = jnp.sum(partial, axis=0)                      # [2, C]
    mu = tot[0] / count
    var = jnp.maximum(tot[1] / count - mu * mu, 0.0)    # one-pass form, clamped
    istd = lax.rsqrt(var + EPS)
    return mu.reshape(1, -1), istd.reshape(1, -1)


def _mosaic_params(*axes):
    return pltpu.CompilerParams(dimension_semantics=axes,
                                vmem_limit_bytes=VMEM_LIMIT)


def _partial_stats(h):
    """[1, 2, C] partial (sum, sum_sq) over the tile's rows (f32)."""
    s = jnp.sum(h, axis=0, keepdims=True)
    ss = jnp.sum(h * h, axis=0, keepdims=True)
    return jnp.concatenate([s, ss], axis=0)[None]


def _mask_rows(h, rows_valid):
    """Zero rows past the logical end of the array (ragged last grid step)."""
    tm = h.shape[0]
    row = pl.program_id(0) * tm + lax.broadcasted_iota(jnp.int32, (tm, 1), 0)
    return jnp.where(row < rows_valid, h, 0.0)


# ------------------------------ Pallas kernels -------------------------------

def _mm_stats_kernel(x_ref, w_ref, h_ref, st_ref, *, rows_valid):
    """h = x @ w (bf16 in, f32 acc); bf16 store + per-tile BN partial stats."""
    h = jnp.dot(x_ref[...], w_ref[...], preferred_element_type=jnp.float32)
    h_ref[...] = h.astype(h_ref.dtype)
    if rows_valid is not None:               # static: only for a ragged last tile
        h = _mask_rows(h, rows_valid)
    st_ref[...] = _partial_stats(h)


def _conv3x3_bn_relu_stats_kernel(h1_ref, w2_ref, g_ref, b_ref, mu_ref,
                                  istd_ref, h2_ref, st_ref, yp_ref):
    """One image: y = relu(bn1(h1)); h2 = conv3x3(y) via 9 shifted matmuls.

    The 1-pixel zero halo is built on-chip in a bf16 VMEM scratch (no HBM pad
    pass, no full-size iota mask)."""
    _, h, w, c = h1_ref.shape
    scale = (istd_ref[...] * g_ref[...]).reshape(1, 1, c)
    shift = (b_ref[...] - mu_ref[...] * istd_ref[...] * g_ref[...]).reshape(1, 1, c)
    y = jnp.maximum(h1_ref[0].astype(jnp.float32) * scale + shift, 0.0)
    y = y.astype(jnp.bfloat16)               # cast once before the 9 slices

    yp_ref[...] = jnp.zeros_like(yp_ref)     # halo stays zero (re-zeroed per step)
    yp_ref[1:h + 1, 1:w + 1, :] = y          # interior
    yp = yp_ref[...]                         # [h+2, w+2, c] bf16

    acc = jnp.zeros((h * w, c), jnp.float32)
    for k in range(9):                       # unrolled at trace time
        dy, dx = k // 3, k % 3
        patch = yp[dy:dy + h, dx:dx + w, :].reshape(h * w, c)
        acc = acc + jnp.dot(patch, w2_ref[k], preferred_element_type=jnp.float32)

    h2_ref[...] = acc.astype(h2_ref.dtype)
    st_ref[...] = _partial_stats(acc)


def _bn_relu_mm_stats_kernel(h_ref, w_ref, g_ref, b_ref, mu_ref, istd_ref,
                             o_ref, st_ref, *, rows_valid):
    """y = relu(bn(h)); o = y @ w (bf16 in, f32 acc); bf16 store + partial stats."""
    scale = istd_ref[...] * g_ref[...]
    shift = b_ref[...] - mu_ref[...] * scale
    y = jnp.maximum(h_ref[...].astype(jnp.float32) * scale + shift, 0.0)
    o = jnp.dot(y.astype(jnp.bfloat16), w_ref[...],
                preferred_element_type=jnp.float32)
    o_ref[...] = o.astype(o_ref.dtype)
    if rows_valid is not None:
        o = _mask_rows(o, rows_valid)
    st_ref[...] = _partial_stats(o)


def _bn_add_relu_nchw_kernel(h_ref, x_ref, g_ref, b_ref, mu_ref, istd_ref, o_ref):
    """out = relu(bn3(h) + residual), emitted directly as one NCHW image."""
    c_out = o_ref.shape[1]
    scale = istd_ref[...] * g_ref[...]
    shift = b_ref[...] - mu_ref[...] * scale
    y = h_ref[...].astype(jnp.float32) * scale + shift     # [hw, c4p]
    yt = y.T                                                # XLU transpose
    o_ref[0] = jnp.maximum(yt[:c_out, :] + x_ref[0], 0.0)   # drop padded channels


# ---------------------------- pallas_call wrappers ---------------------------

def _conv1x1_stats(x_bf, w_bf, tm):
    m, k = x_bf.shape
    c = w_bf.shape[1]
    t = pl.cdiv(m, tm)
    rows_valid = None if m % tm == 0 else m
    kernel = functools.partial(_mm_stats_kernel, rows_valid=rows_valid)
    return pl.pallas_call(
        kernel,
        grid=(t,),
        in_specs=[pl.BlockSpec((tm, k), lambda i: (i, 0)),
                  pl.BlockSpec((k, c), lambda i: (0, 0))],
        out_specs=(pl.BlockSpec((tm, c), lambda i: (i, 0)),
                   pl.BlockSpec((1, 2, c), lambda i: (i, 0, 0))),
        out_shape=(jax.ShapeDtypeStruct((m, c), jnp.bfloat16),
                   jax.ShapeDtypeStruct((t, 2, c), jnp.float32)),
        compiler_params=_mosaic_params("parallel"),
        cost_estimate=pl.CostEstimate(
            flops=2 * m * k * c, transcendentals=0,
            bytes_accessed=m * k * 2 + k * c * 2 + m * c * 2 + t * 2 * c * 4),
    )(x_bf, w_bf)


def _conv3x3_bn_stats(h1_img, w2_bf, g, b, mu, istd):
    n, h, w, c = h1_img.shape
    hw = h * w
    m = n * hw
    vec = pl.BlockSpec((1, c), lambda i: (0, 0))
    return pl.pallas_call(
        _conv3x3_bn_relu_stats_kernel,
        grid=(n,),
        in_specs=[pl.BlockSpec((1, h, w, c), lambda i: (i, 0, 0, 0)),
                  pl.BlockSpec((9, c, c), lambda i: (0, 0, 0)),
                  vec, vec, vec, vec],
        out_specs=(pl.BlockSpec((hw, c), lambda i: (i, 0)),
                   pl.BlockSpec((1, 2, c), lambda i: (i, 0, 0))),
        out_shape=(jax.ShapeDtypeStruct((m, c), jnp.bfloat16),
                   jax.ShapeDtypeStruct((n, 2, c), jnp.float32)),
        scratch_shapes=[pltpu.VMEM((h + 2, w + 2, c), jnp.bfloat16)],
        compiler_params=_mosaic_params("parallel"),
        cost_estimate=pl.CostEstimate(
            flops=2 * m * 9 * c * c + 8 * m * c, transcendentals=0,
            bytes_accessed=m * c * 2 + 9 * c * c * 2 + m * c * 2 + n * 2 * c * 4),
    )(h1_img, w2_bf, g, b, mu, istd)


def _bn_relu_conv1x1_stats(h2, w_bf, g, b, mu, istd, tm):
    m, k = h2.shape
    c = w_bf.shape[1]
    t = pl.cdiv(m, tm)
    rows_valid = None if m % tm == 0 else m
    kernel = functools.partial(_bn_relu_mm_stats_kernel, rows_valid=rows_valid)
    vec = pl.BlockSpec((1, k), lambda i: (0, 0))
    return pl.pallas_call(
        kernel,
        grid=(t,),
        in_specs=[pl.BlockSpec((tm, k), lambda i: (i, 0)),
                  pl.BlockSpec((k, c), lambda i: (0, 0)),
                  vec, vec, vec, vec],
        out_specs=(pl.BlockSpec((tm, c), lambda i: (i, 0)),
                   pl.BlockSpec((1, 2, c), lambda i: (i, 0, 0))),
        out_shape=(jax.ShapeDtypeStruct((m, c), jnp.bfloat16),
                   jax.ShapeDtypeStruct((t, 2, c), jnp.float32)),
        compiler_params=_mosaic_params("parallel"),
        cost_estimate=pl.CostEstimate(
            flops=2 * m * k * c + 6 * m * k, transcendentals=0,
            bytes_accessed=m * k * 2 + k * c * 2 + m * c * 2 + t * 2 * c * 4),
    )(h2, w_bf, g, b, mu, istd)


def _bn_add_relu_nchw(h3, x_res, g, b, mu, istd):
    m, c = h3.shape
    n, c_out, hw = x_res.shape
    vec = pl.BlockSpec((1, c), lambda i: (0, 0))
    return pl.pallas_call(
        _bn_add_relu_nchw_kernel,
        grid=(n,),
        in_specs=[pl.BlockSpec((hw, c), lambda i: (i, 0)),
                  pl.BlockSpec((1, c_out, hw), lambda i: (i, 0, 0)),  # NCHW residual
                  vec, vec, vec, vec],
        out_specs=pl.BlockSpec((1, c_out, hw), lambda i: (i, 0, 0)),
        out_shape=jax.ShapeDtypeStruct((n, c_out, hw), jnp.float32),
        compiler_params=_mosaic_params("parallel"),
        cost_estimate=pl.CostEstimate(
            flops=6 * m * c_out, transcendentals=0,
            bytes_accessed=m * c * 2 + 2 * m * c_out * 4),
    )(h3, x_res, g, b, mu, istd)


# ------------------------------- Forward pass --------------------------------

def bottleneck_forward(x_nchw, params):
    """Bottleneck forward (stride=1, identity residual). Input/output: NCHW f32."""
    n, cin, h, w = x_nchw.shape
    p = params["w1"].shape[0]            # planes
    c4 = params["w3"].shape[0]           # planes * expansion
    assert c4 == cin, "identity residual requires inplanes == planes * expansion"
    hw = h * w
    m = n * hw
    cp, pp, c4p = _round_up(cin, LANE), _round_up(p, LANE), _round_up(c4, LANE)
    tm = _pick_tile(m, TILE_TARGET)

    # conv1 operand: channels-last, lane-padded, bf16. This is the only extra
    # copy of x in HBM; the residual is read from the original NCHW f32 tensor.
    x_bf = _pad2d(jnp.transpose(x_nchw, (0, 2, 3, 1)).reshape(m, cin),
                  m, cp).astype(jnp.bfloat16)

    # weights as [Cin_k, Cout_k], lane-padded, bf16 for the MXU
    w1 = _pad2d(params["w1"].reshape(p, cin).T, cp, pp).astype(jnp.bfloat16)
    w2 = jnp.transpose(params["w2"], (2, 3, 1, 0)).reshape(9, p, p)
    w2 = jnp.pad(w2, ((0, 0), (0, pp - p), (0, pp - p))).astype(jnp.bfloat16)
    w3 = _pad2d(params["w3"].reshape(c4, p).T, pp, c4p).astype(jnp.bfloat16)
    g1, b1 = _pad_vec(params["g1"], pp), _pad_vec(params["b1"], pp)
    g2, b2 = _pad_vec(params["g2"], pp), _pad_vec(params["b2"], pp)
    g3, b3 = _pad_vec(params["g3"], c4p), _pad_vec(params["b3"], c4p)

    # conv1 (1x1): tiled matmul + partial BN1 stats (bf16 activation out)
    h1, st1 = _conv1x1_stats(x_bf, w1, tm)
    mu1, istd1 = _finalize_stats(st1, m)

    # conv2 (3x3): bn1+relu fused; on-chip zero halo; 9 shifted MXU matmuls
    h2, st2 = _conv3x3_bn_stats(h1.reshape(n, h, w, pp), w2, g1, b1, mu1, istd1)
    mu2, istd2 = _finalize_stats(st2, m)

    # conv3 (1x1): bn2+relu fused with the matmul + partial BN3 stats
    h3, st3 = _bn_relu_conv1x1_stats(h2, w3, g2, b2, mu2, istd2, tm)
    mu3, istd3 = _finalize_stats(st3, m)

    # bn3 + residual add + relu, emitted directly as NCHW (no XLA slice/transpose)
    x_res = x_nchw.reshape(n, cin, hw).astype(jnp.float32)   # free reshape
    out = _bn_add_relu_nchw(h3, x_res, g3, b3, mu3, istd3)
    return out.reshape(n, c4, h, w)                           # free reshape


# ---------------------------- Pure-JAX reference ------------------------------

def ref_forward(x, params):
    """XLA reference mirroring the kernels' numerics: bf16 MXU operands, f32
    accumulation / BN statistics, bf16 storage of inter-stage activations
    (BN affine applied to the bf16-rounded values)."""
    dn = ("NCHW", "OIHW", "NCHW")

    def conv(y, wgt, pad):
        return lax.conv_general_dilated(
            y.astype(jnp.bfloat16), wgt.astype(jnp.bfloat16), (1, 1), pad,
            dimension_numbers=dn, preferred_element_type=jnp.float32)

    def bn_q(hf, g, beta):
        mu = jnp.mean(hf, axis=(0, 2, 3), keepdims=True)
        var = jnp.mean(jnp.square(hf - mu), axis=(0, 2, 3), keepdims=True)
        hq = hf.astype(jnp.bfloat16).astype(jnp.float32)   # bf16 storage rounding
        return (hq - mu) * lax.rsqrt(var + EPS) * g.reshape(1, -1, 1, 1) \
            + beta.reshape(1, -1, 1, 1)

    y = jnp.maximum(bn_q(conv(x, params["w1"], "VALID"),
                         params["g1"], params["b1"]), 0.0)
    y = jnp.maximum(bn_q(conv(y, params["w2"], ((1, 1), (1, 1))),
                         params["g2"], params["b2"]), 0.0)
    y = bn_q(conv(y, params["w3"], "VALID"), params["g3"], params["b3"]) + x
    return jnp.maximum(y, 0.0)


# ------------------------------------ Main ------------------------------------

if __name__ == "__main__":
    # Bottleneck(inplanes=32, planes=8), expansion=4, stride=1, small spatial.
    N, INPLANES, PLANES, H, W = 2, 32, 8, 8, 8
    EXP = 4

    key = jax.random.PRNGKey(0)
    k = jax.random.split(key, 9)

    params = {
        "w1": jax.random.normal(k[0], (PLANES, INPLANES, 1, 1), jnp.float32) * 0.1,
        "g1": 1.0 + 0.1 * jax.random.normal(k[1], (PLANES,), jnp.float32),
        "b1": 0.1 * jax.random.normal(k[2], (PLANES,), jnp.float32),
        "w2": jax.random.normal(k[3], (PLANES, PLANES, 3, 3), jnp.float32) * 0.1,
        "g2": 1.0 + 0.1 * jax.random.normal(k[4], (PLANES,), jnp.float32),
        "b2": 0.1 * jax.random.normal(k[5], (PLANES,), jnp.float32),
        "w3": jax.random.normal(k[6], (PLANES * EXP, PLANES, 1, 1), jnp.float32) * 0.1,
        "g3": 1.0 + 0.1 * jax.random.normal(k[7], (PLANES * EXP,), jnp.float32),
        "b3": jnp.zeros((PLANES * EXP,), jnp.float32),
    }
    x = jax.random.normal(k[8], (N, INPLANES, H, W), jnp.float32)

    out = jax.block_until_ready(jax.jit(bottleneck_forward)(x, params))
    ref = ref_forward(x, params)

    assert out.shape == (N, PLANES * EXP, H, W), out.shape
    err = float(jnp.max(jnp.abs(out - ref)))
    # bf16 MXU operands + bf16 inter-stage storage on both paths; residual,
    # accumulation and BN statistics in f32.  Tolerance covers the rare element
    # that lands on a bf16 rounding boundary and rounds differently under the
    # two (kernel vs XLA) f32 accumulation orders.
    assert jnp.allclose(out, ref, atol=2e-2, rtol=2e-2), f"max abs err = {err}"

    print("KERNEL_OK")
</pallas_src>

<mosaic_0001>
module attributes {stable_mosaic.version = 11 : i64} {
  func.func @_mm_stats_kernel(%arg0: i32, %arg1: memref<128x128xbf16, #tpu.memory_space<vmem>>, %arg2: memref<128x128xbf16, #tpu.memory_space<vmem>>, %arg3: memref<128x128xbf16, #tpu.memory_space<vmem>>, %arg4: memref<1x2x128xf32, #tpu.memory_space<vmem>>) attributes {dimension_semantics = [#tpu.dimension_semantics<parallel>], iteration_bounds = array<i64: 1>, scalar_prefetch = 0 : i64, scratch_operands = 0 : i64, tpu.core_type = #tpu.core_type<tc>, window_params = [{transform_indices = @transform_0, window_bounds = array<i64: 128, 128>}, {pipeline_mode = #tpu.pipeline_mode<synchronous>, transform_indices = @transform_1, window_bounds = array<i64: 128, 128>}, {transform_indices = @transform_2, window_bounds = array<i64: 128, 128>}, {transform_indices = @transform_3, window_bounds = array<i64: 1, 2, 128>}]} {
    %c0 = arith.constant 0 : index
    %c0_0 = arith.constant 0 : index
    %0 = vector.load %arg1[%c0, %c0_0] : memref<128x128xbf16, #tpu.memory_space<vmem>>, vector<128x128xbf16>
    %c0_1 = arith.constant 0 : index
    %c0_2 = arith.constant 0 : index
    %1 = vector.load %arg2[%c0_1, %c0_2] : memref<128x128xbf16, #tpu.memory_space<vmem>>, vector<128x128xbf16>
    %cst = arith.constant dense<0.000000e+00> : vector<128x128xf32>
    %2 = tpu.matmul %0, %1, %cst {dimension_numbers = #tpu.dot_dimension_numbers<[1], [0], [0], [1], [0, 0, 1, 1], [], []>} : vector<128x128xbf16>, vector<128x128xbf16>, vector<128x128xf32> -> vector<128x128xf32>
    %3 = arith.truncf %2 : vector<128x128xf32> to vector<128x128xbf16>
    %c0_3 = arith.constant 0 : index
    %c0_4 = arith.constant 0 : index
    %4 = vector.load %arg3[%c0_3, %c0_4] : memref<128x128xbf16, #tpu.memory_space<vmem>>, vector<128x128xbf16>
    tpu.vector_store %arg3[%c0_3, %c0_4], %3 {strides = array<i32>} : memref<128x128xbf16, #tpu.memory_space<vmem>>, vector<128x128xbf16>,
    %cst_5 = arith.constant dense<0.000000e+00> : vector<128xf32>
    %5 = vector.multi_reduction <add>, %2, %cst_5 [0] : vector<128x128xf32> to vector<128xf32>
    %6 = vector.shape_cast %5 : vector<128xf32> to vector<1x128xf32>
    %7 = arith.mulf %2, %2 : vector<128x128xf32>
    %cst_6 = arith.constant dense<0.000000e+00> : vector<128xf32>
    %8 = vector.multi_reduction <add>, %7, %cst_6 [0] : vector<128x128xf32> to vector<128xf32>
    %9 = vector.shape_cast %8 : vector<128xf32> to vector<1x128xf32>
    %10 = tpu.concatenate %6, %9 in 0 : vector<1x128xf32>, vector<1x128xf32> -> vector<2x128xf32>
    %11 = vector.shape_cast %10 : vector<2x128xf32> to vector<1x2x128xf32>
    %c0_7 = arith.constant 0 : index
    %c0_8 = arith.constant 0 : index
    %c0_9 = arith.constant 0 : index
    %12 = vector.load %arg4[%c0_7, %c0_8, %c0_9] : memref<1x2x128xf32, #tpu.memory_space<vmem>>, vector<1x2x128xf32>
    tpu.vector_store %arg4[%c0_7, %c0_8, %c0_9], %11 {strides = array<i32>} : memref<1x2x128xf32, #tpu.memory_space<vmem>>, vector<1x2x128xf32>,
    return
  }
  func.func @transform_0(%arg0: i32) -> (i32, i32) {
    %c0_i32 = arith.constant 0 : i32
    %c0_i32_0 = arith.constant 0 : i32
    return %arg0, %c0_i32 : i32, i32
  }
  func.func @transform_1(%arg0: i32) -> (i32, i32) {
    %c0_i32 = arith.constant 0 : i32
    %c0_i32_0 = arith.constant 0 : i32
    %c0_i32_1 = arith.constant 0 : i32
    return %c0_i32, %c0_i32_0 : i32, i32
  }
  func.func @transform_2(%arg0: i32) -> (i32, i32) {
    %c0_i32 = arith.constant 0 : i32
    %c0_i32_0 = arith.constant 0 : i32
    return %arg0, %c0_i32 : i32, i32
  }
  func.func @transform_3(%arg0: i32) -> (i32, i32, i32) {
    %c0_i32 = arith.constant 0 : i32
    %c0_i32_0 = arith.constant 0 : i32
    %c0_i32_1 = arith.constant 0 : i32
    return %arg0, %c0_i32, %c0_i32_0 : i32, i32, i32
  }
}

module attributes {stable_mosaic.version = 11 : i64} {
  func.func @_conv3x3_bn_relu_stats_kernel(%arg0: i32, %arg1: memref<1x8x8x128xbf16, #tpu.memory_space<vmem>>, %arg2: memref<9x128x128xbf16, #tpu.memory_space<vmem>>, %arg3: memref<1x128xf32, #tpu.memory_space<vmem>>, %arg4: memref<1x128xf32, #tpu.memory_space<vmem>>, %arg5: memref<1x128xf32, #tpu.memory_space<vmem>>, %arg6: memref<1x128xf32, #tpu.memory_space<vmem>>, %arg7: memref<64x128xbf16, #tpu.memory_space<vmem>>, %arg8: memref<1x2x128xf32, #tpu.memory_space<vmem>>, %arg9: memref<10x10x128xbf16, #tpu.memory_space<vmem>>) attributes {dimension_semantics = [#tpu.dimension_semantics<parallel>], iteration_bounds = array<i64: 2>, scalar_prefetch = 0 : i64, scratch_operands = 1 : i64, tpu.core_type = #tpu.core_type<tc>, window_params = [{transform_indices = @transform_0, window_bounds = array<i64: 1, 8, 8, 128>}, {pipeline_mode = #tpu.pipeline_mode<synchronous>, transform_indices = @transform_1, window_bounds = array<i64: 9, 128, 128>}, {pipeline_mode = #tpu.pipeline_mode<synchronous>, transform_indices = @transform_2, window_bounds = array<i64: 1, 128>}, {pipeline_mode = #tpu.pipeline_mode<synchronous>, transform_indices = @transform_3, window_bounds = array<i64: 1, 128>}, {pipeline_mode = #tpu.pipeline_mode<synchronous>, transform_indices = @transform_4, window_bounds = array<i64: 1, 128>}, {pipeline_mode = #tpu.pipeline_mode<synchronous>, transform_indices = @transform_5, window_bounds = array<i64: 1, 128>}, {transform_indices = @transform_6, window_bounds = array<i64: 64, 128>}, {transform_indices = @transform_7, window_bounds = array<i64: 1, 2, 128>}]} {
    %c0 = arith.constant 0 : index
    %c0_0 = arith.constant 0 : index
    %0 = vector.load %arg6[%c0, %c0_0] : memref<1x128xf32, #tpu.memory_space<vmem>>, vector<1x128xf32>
    %c0_1 = arith.constant 0 : index
    %c0_2 = arith.constant 0 : index
    %1 = vector.load %arg3[%c0_1, %c0_2] : memref<1x128xf32, #tpu.memory_space<vmem>>, vector<1x128xf32>
    %2 = arith.mulf %0, %1 : vector<1x128xf32>
    %3 = vector.shape_cast %2 : vector<1x128xf32> to vector<1x1x128xf32>
    %c0_3 = arith.constant 0 : index
    %c0_4 = arith.constant 0 : index
    %4 = vector.load %arg4[%c0_3, %c0_4] : memref<1x128xf32, #tpu.memory_space<vmem>>, vector<1x128xf32>
    %c0_5 = arith.constant 0 : index
    %c0_6 = arith.constant 0 : index
    %5 = vector.load %arg5[%c0_5, %c0_6] : memref<1x128xf32, #tpu.memory_space<vmem>>, vector<1x128xf32>
    %c0_7 = arith.constant 0 : index
    %c0_8 = arith.constant 0 : index
    %6 = vector.load %arg6[%c0_7, %c0_8] : memref<1x128xf32, #tpu.memory_space<vmem>>, vector<1x128xf32>
    %7 = arith.mulf %5, %6 : vector<1x128xf32>
    %c0_9 = arith.constant 0 : index
    %c0_10 = arith.constant 0 : index
    %8 = vector.load %arg3[%c0_9, %c0_10] : memref<1x128xf32, #tpu.memory_space<vmem>>, vector<1x128xf32>
    %9 = arith.mulf %7, %8 : vector<1x128xf32>
    %10 = arith.subf %4, %9 : vector<1x128xf32>
    %11 = vector.shape_cast %10 : vector<1x128xf32> to vector<1x1x128xf32>
    %c0_11 = arith.constant 0 : index
    %c0_12 = arith.constant 0 : index
    %c0_13 = arith.constant 0 : index
    %c0_14 = arith.constant 0 : index
    %12 = vector.load %arg1[%c0_11, %c0_12, %c0_13, %c0_14] : memref<1x8x8x128xbf16, #tpu.memory_space<vmem>>, vector<1x8x8x128xbf16>
    %13 = vector.shape_cast %12 : vector<1x8x8x128xbf16> to vector<8x8x128xbf16>
    %14 = arith.extf %13 : vector<8x8x128xbf16> to vector<8x8x128xf32>
    %15 = vector.broadcast %3 : vector<1x1x128xf32> to vector<8x8x128xf32>
    %16 = arith.mulf %14, %15 : vector<8x8x128xf32>
    %17 = vector.broadcast %11 : vector<1x1x128xf32> to vector<8x8x128xf32>
    %18 = arith.addf %16, %17 : vector<8x8x128xf32>
    %cst = arith.constant 0.000000e+00 : f32
    %19 = vector.broadcast %cst : f32 to vector<8x8x128xf32>
    %20 = arith.maximumf %18, %19 : vector<8x8x128xf32>
    %21 = arith.truncf %20 : vector<8x8x128xf32> to vector<8x8x128xbf16>
    %cst_15 = arith.constant 0.000000e+00 : bf16
    %22 = vector.broadcast %cst_15 : bf16 to vector<10x10x128xbf16>
    %c0_16 = arith.constant 0 : index
    %c0_17 = arith.constant 0 : index
    %c0_18 = arith.constant 0 : index
    %23 = vector.load %arg9[%c0_16, %c0_17, %c0_18] : memref<10x10x128xbf16, #tpu.memory_space<vmem>>, vector<10x10x128xbf16>
    tpu.vector_store %arg9[%c0_16, %c0_17, %c0_18], %22 {strides = array<i32>} : memref<10x10x128xbf16, #tpu.memory_space<vmem>>, vector<10x10x128xbf16>,
    %c1 = arith.constant 1 : index
    %c1_19 = arith.constant 1 : index
    %c0_20 = arith.constant 0 : index
    %24 = vector.load %arg9[%c1, %c1_19, %c0_20] : memref<10x10x128xbf16, #tpu.memory_space<vmem>>, vector<8x8x128xbf16>
    tpu.vector_store %arg9[%c1, %c1_19, %c0_20], %21 {strides = array<i32>} : memref<10x10x128xbf16, #tpu.memory_space<vmem>>, vector<8x8x128xbf16>,
    %c0_21 = arith.constant 0 : index
    %c0_22 = arith.constant 0 : index
    %c0_23 = arith.constant 0 : index
    %25 = vector.load %arg9[%c0_21, %c0_22, %c0_23] : memref<10x10x128xbf16, #tpu.memory_space<vmem>>, vector<10x10x128xbf16>
    %cst_24 = arith.constant 0.000000e+00 : f32
    %26 = vector.broadcast %cst_24 : f32 to vector<64x128xf32>
    %27 = vector.extract_strided_slice %25 {offsets = [0, 0, 0], sizes = [8, 8, 128], strides = [1, 1, 1]} : vector<10x10x128xbf16> to vector<8x8x128xbf16>
    %28 = vector.shape_cast %27 : vector<8x8x128xbf16> to vector<64x128xbf16>
    %c0_25 = arith.constant 0 : index
    %c0_26 = arith.constant 0 : index
    %c0_27 = arith.constant 0 : index
    %29 = vector.load %arg2[%c0_25, %c0_26, %c0_27] : memref<9x128x128xbf16, #tpu.memory_space<vmem>>, vector<1x128x128xbf16>
    %30 = vector.shape_cast %29 : vector<1x128x128xbf16> to vector<128x128xbf16>
    %cst_28 = arith.constant dense<0.000000e+00> : vector<64x128xf32>
    %31 = tpu.matmul %28, %30, %cst_28 {dimension_numbers = #tpu.dot_dimension_numbers<[1], [0], [0], [1], [0, 0, 1, 1], [], []>} : vector<64x128xbf16>, vector<128x128xbf16>, vector<64x128xf32> -> vector<64x128xf32>
    %32 = arith.addf %26, %31 : vector<64x128xf32>
    %33 = vector.extract_strided_slice %25 {offsets = [0, 1, 0], sizes = [8, 8, 128], strides = [1, 1, 1]} : vector<10x10x128xbf16> to vector<8x8x128xbf16>
    %34 = vector.shape_cast %33 : vector<8x8x128xbf16> to vector<64x128xbf16>
    %c1_29 = arith.constant 1 : index
    %c0_30 = arith.constant 0 : index
    %c0_31 = arith.constant 0 : index
    %35 = vector.load %arg2[%c1_29, %c0_30, %c0_31] : memref<9x128x128xbf16, #tpu.memory_space<vmem>>, vector<1x128x128xbf16>
    %36 = vector.shape_cast %35 : vector<1x128x128xbf16> to vector<128x128xbf16>
    %cst_32 = arith.constant dense<0.000000e+00> : vector<64x128xf32>
    %37 = tpu.matmul %34, %36, %cst_32 {dimension_numbers = #tpu.dot_dimension_numbers<[1], [0], [0], [1], [0, 0, 1, 1], [], []>} : vector<64x128xbf16>, vector<128x128xbf16>, vector<64x128xf32> -> vector<64x128xf32>
    %38 = arith.addf %32, %37 : vector<64x128xf32>
    %39 = vector.extract_strided_slice %25 {offsets = [0, 2, 0], sizes = [8, 8, 128], strides = [1, 1, 1]} : vector<10x10x128xbf16> to vector<8x8x128xbf16>
    %40 = vector.shape_cast %39 : vector<8x8x128xbf16> to vector<64x128xbf16>
    %c2 = arith.constant 2 : index
    %c0_33 = arith.constant 0 : index
    %c0_34 = arith.constant 0 : index
    %41 = vector.load %arg2[%c2, %c0_33, %c0_34] : memref<9x128x128xbf16, #tpu.memory_space<vmem>>, vector<1x128x128xbf16>
    %42 = vector.shape_cast %41 : vector<1x128x128xbf16> to vector<128x128xbf16>
    %cst_35 = arith.constant dense<0.000000e+00> : vector<64x128xf32>
    %43 = tpu.matmul %40, %42, %cst_35 {dimension_numbers = #tpu.dot_dimension_numbers<[1], [0], [0], [1], [0, 0, 1, 1], [], []>} : vector<64x128xbf16>, vector<128x128xbf16>, vector<64x128xf32> -> vector<64x128xf32>
    %44 = arith.addf %38, %43 : vector<64x128xf32>
    %45 = vector.extract_strided_slice %25 {offsets = [1, 0, 0], sizes = [8, 8, 128], strides = [1, 1, 1]} : vector<10x10x128xbf16> to vector<8x8x128xbf16>
    %46 = vector.shape_cast %45 : vector<8x8x128xbf16> to vector<64x128xbf16>
    %c3 = arith.constant 3 : index
    %c0_36 = arith.constant 0 : index
    %c0_37 = arith.constant 0 : index
    %47 = vector.load %arg2[%c3, %c0_36, %c0_37] : memref<9x128x128xbf16, #tpu.memory_space<vmem>>, vector<1x128x128xbf16>
    %48 = vector.shape_cast %47 : vector<1x128x128xbf16> to vector<128x128xbf16>
    %cst_38 = arith.constant dense<0.000000e+00> : vector<64x128xf32>
    %49 = tpu.matmul %46, %48, %cst_38 {dimension_numbers = #tpu.dot_dimension_numbers<[1], [0], [0], [1], [0, 0, 1, 1], [], []>} : vector<64x128xbf16>, vector<128x128xbf16>, vector<64x128xf32> -> vector<64x128xf32>
    %50 = arith.addf %44, %49 : vector<64x128xf32>
    %51 = vector.extract_strided_slice %25 {offsets = [1, 1, 0], sizes = [8, 8, 128], strides = [1, 1, 1]} : vector<10x10x128xbf16> to vector<8x8x128xbf16>
    %52 = vector.shape_cast %51 : vector<8x8x128xbf16> to vector<64x128xbf16>
    %c4 = arith.constant 4 : index
    %c0_39 = arith.constant 0 : index
    %c0_40 = arith.constant 0 : index
    %53 = vector.load %arg2[%c4, %c0_39, %c0_40] : memref<9x128x128xbf16, #tpu.memory_space<vmem>>, vector<1x128x128xbf16>
    %54 = vector.shape_cast %53 : vector<1x128x128xbf16> to vector<128x128xbf16>
    %cst_41 = arith.constant dense<0.000000e+00> : vector<64x128xf32>
    %55 = tpu.matmul %52, %54, %cst_41 {dimension_numbers = #tpu.dot_dimension_numbers<[1], [0], [0], [1], [0, 0, 1, 1], [], []>} : vector<64x128xbf16>, vector<128x128xbf16>, vector<64x128xf32> -> vector<64x128xf32>
    %56 = arith.addf %50, %55 : vector<64x128xf32>
    %57 = vector.extract_strided_slice %25 {offsets = [1, 2, 0], sizes = [8, 8, 128], strides = [1, 1, 1]} : vector<10x10x128xbf16> to vector<8x8x128xbf16>
    %58 = vector.shape_cast %57 : vector<8x8x128xbf16> to vector<64x128xbf16>
    %c5 = arith.constant 5 : index
    %c0_42 = arith.constant 0 : index
    %c0_43 = arith.constant 0 : index
    %59 = vector.load %arg2[%c5, %c0_42, %c0_43] : memref<9x128x128xbf16, #tpu.memory_space<vmem>>, vector<1x128x128xbf16>
    %60 = vector.shape_cast %59 : vector<1x128x128xbf16> to vector<128x128xbf16>
    %cst_44 = arith.constant dense<0.000000e+00> : vector<64x128xf32>
    %61 = tpu.matmul %58, %60, %cst_44 {dimension_numbers = #tpu.dot_dimension_numbers<[1], [0], [0], [1], [0, 0, 1, 1], [], []>} : vector<64x128xbf16>, vector<128x128xbf16>, vector<64x128xf32> -> vector<64x128xf32>
    %62 = arith.addf %56, %61 : vector<64x128xf32>
    %63 = vector.extract_strided_slice %25 {offsets = [2, 0, 0], sizes = [8, 8, 128], strides = [1, 1, 1]} : vector<10x10x128xbf16> to vector<8x8x128xbf16>
    %64 = vector.shape_cast %63 : vector<8x8x128xbf16> to vector<64x128xbf16>
    %c6 = arith.constant 6 : index
    %c0_45 = arith.constant 0 : index
    %c0_46 = arith.constant 0 : index
    %65 = vector.load %arg2[%c6, %c0_45, %c0_46] : memref<9x128x128xbf16, #tpu.memory_space<vmem>>, vector<1x128x128xbf16>
    %66 = vector.shape_cast %65 : vector<1x128x128xbf16> to vector<128x128xbf16>
    %cst_47 = arith.constant dense<0.000000e+00> : vector<64x128xf32>
    %67 = tpu.matmul %64, %66, %cst_47 {dimension_numbers = #tpu.dot_dimension_numbers<[1], [0], [0], [1], [0, 0, 1, 1], [], []>} : vector<64x128xbf16>, vector<128x128xbf16>, vector<64x128xf32> -> vector<64x128xf32>
    %68 = arith.addf %62, %67 : vector<64x128xf32>
    %69 = vector.extract_strided_slice %25 {offsets = [2, 1, 0], sizes = [8, 8, 128], strides = [1, 1, 1]} : vector<10x10x128xbf16> to vector<8x8x128xbf16>
    %70 = vector.shape_cast %69 : vector<8x8x128xbf16> to vector<64x128xbf16>
    %c7 = arith.constant 7 : index
    %c0_48 = arith.constant 0 : index
    %c0_49 = arith.constant 0 : index
    %71 = vector.load %arg2[%c7, %c0_48, %c0_49] : memref<9x128x128xbf16, #tpu.memory_space<vmem>>, vector<1x128x128xbf16>
    %72 = vector.shape_cast %71 : vector<1x128x128xbf16> to vector<128x128xbf16>
    %cst_50 = arith.constant dense<0.000000e+00> : vector<64x128xf32>
    %73 = tpu.matmul %70, %72, %cst_50 {dimension_numbers = #tpu.dot_dimension_numbers<[1], [0], [0], [1], [0, 0, 1, 1], [], []>} : vector<64x128xbf16>, vector<128x128xbf16>, vector<64x128xf32> -> vector<64x128xf32>
    %74 = arith.addf %68, %73 : vector<64x128xf32>
    %75 = vector.extract_strided_slice %25 {offsets = [2, 2, 0], sizes = [8, 8, 128], strides = [1, 1, 1]} : vector<10x10x128xbf16> to vector<8x8x128xbf16>
    %76 = vector.shape_cast %75 : vector<8x8x128xbf16> to vector<64x128xbf16>
    %c8 = arith.constant 8 : index
    %c0_51 = arith.constant 0 : index
    %c0_52 = arith.constant 0 : index
    %77 = vector.load %arg2[%c8, %c0_51, %c0_52] : memref<9x128x128xbf16, #tpu.memory_space<vmem>>, vector<1x128x128xbf16>
    %78 = vector.shape_cast %77 : vector<1x128x128xbf16> to vector<128x128xbf16>
    %cst_53 = arith.constant dense<0.000000e+00> : vector<64x128xf32>
    %79 = tpu.matmul %76, %78, %cst_53 {dimension_numbers = #tpu.dot_dimension_numbers<[1], [0], [0], [1], [0, 0, 1, 1], [], []>} : vector<64x128xbf16>, vector<128x128xbf16>, vector<64x128xf32> -> vector<64x128xf32>
    %80 = arith.addf %74, %79 : vector<64x128xf32>
    %81 = arith.truncf %80 : vector<64x128xf32> to vector<64x128xbf16>
    %c0_54 = arith.constant 0 : index
    %c0_55 = arith.constant 0 : index
    %82 = vector.load %arg7[%c0_54, %c0_55] : memref<64x128xbf16, #tpu.memory_space<vmem>>, vector<64x128xbf16>
    tpu.vector_store %arg7[%c0_54, %c0_55], %81 {strides = array<i32>} : memref<64x128xbf16, #tpu.memory_space<vmem>>, vector<64x128xbf16>,
    %cst_56 = arith.constant dense<0.000000e+00> : vector<128xf32>
    %83 = vector.multi_reduction <add>, %80, %cst_56 [0] : vector<64x128xf32> to vector<128xf32>
    %84 = vector.shape_cast %83 : vector<128xf32> to vector<1x128xf32>
    %85 = arith.mulf %80, %80 : vector<64x128xf32>
    %cst_57 = arith.constant dense<0.000000e+00> : vector<128xf32>
    %86 = vector.multi_reduction <add>, %85, %cst_57 [0] : vector<64x128xf32> to vector<128xf32>
    %87 = vector.shape_cast %86 : vector<128xf32> to vector<1x128xf32>
    %88 = tpu.concatenate %84, %87 in 0 : vector<1x128xf32>, vector<1x128xf32> -> vector<2x128xf32>
    %89 = vector.shape_cast %88 : vector<2x128xf32> to vector<1x2x128xf32>
    %c0_58 = arith.constant 0 : index
    %c0_59 = arith.constant 0 : index
    %c0_60 = arith.constant 0 : index
    %90 = vector.load %arg8[%c0_58, %c0_59, %c0_60] : memref<1x2x128xf32, #tpu.memory_space<vmem>>, vector<1x2x128xf32>
    tpu.vector_store %arg8[%c0_58, %c0_59, %c0_60], %89 {strides = array<i32>} : memref<1x2x128xf32, #tpu.memory_space<vmem>>, vector<1x2x128xf32>,
    return
  }
  func.func @transform_0(%arg0: i32) -> (i32, i32, i32, i32) {
    %c0_i32 = arith.constant 0 : i32
    %c0_i32_0 = arith.constant 0 : i32
    %c0_i32_1 = arith.constant 0 : i32
    %c0_i32_2 = arith.constant 0 : i32
    return %arg0, %c0_i32, %c0_i32_0, %c0_i32_1 : i32, i32, i32, i32
  }
  func.func @transform_1(%arg0: i32) -> (i32, i32, i32) {
    %c0_i32 = arith.constant 0 : i32
    %c0_i32_0 = arith.constant 0 : i32
    %c0_i32_1 = arith.constant 0 : i32
    %c0_i32_2 = arith.constant 0 : i32
    return %c0_i32, %c0_i32_0, %c0_i32_1 : i32, i32, i32
  }
  func.func @transform_2(%arg0: i32) -> (i32, i32) {
    %c0_i32 = arith.constant 0 : i32
    %c0_i32_0 = arith.constant 0 : i32
    %c0_i32_1 = arith.constant 0 : i32
    return %c0_i32, %c0_i32_0 : i32, i32
  }
  func.func @transform_3(%arg0: i32) -> (i32, i32) {
    %c0_i32 = arith.constant 0 : i32
    %c0_i32_0 = arith.constant 0 : i32
    %c0_i32_1 = arith.constant 0 : i32
    return %c0_i32, %c0_i32_0 : i32, i32
  }
  func.func @transform_4(%arg0: i32) -> (i32, i32) {
    %c0_i32 = arith.constant 0 : i32
    %c0_i32_0 = arith.constant 0 : i32
    %c0_i32_1 = arith.constant 0 : i32
    return %c0_i32, %c0_i32_0 : i32, i32
  }
  func.func @transform_5(%arg0: i32) -> (i32, i32) {
    %c0_i32 = arith.constant 0 : i32
    %c0_i32_0 = arith.constant 0 : i32
    %c0_i32_1 = arith.constant 0 : i32
    return %c0_i32, %c0_i32_0 : i32, i32
  }
  func.func @transform_6(%arg0: i32) -> (i32, i32) {
    %c0_i32 = arith.constant 0 : i32
    %c0_i32_0 = arith.constant 0 : i32
    return %arg0, %c0_i32 : i32, i32
  }
  func.func @transform_7(%arg0: i32) -> (i32, i32, i32) {
    %c0_i32 = arith.constant 0 : i32
    %c0_i32_0 = arith.constant 0 : i32
    %c0_i32_1 = arith.constant 0 : i32
    return %arg0, %c0_i32, %c0_i32_0 : i32, i32, i32
  }
}

module attributes {stable_mosaic.version = 11 : i64} {
  func.func @_bn_relu_mm_stats_kernel(%arg0: i32, %arg1: memref<128x128xbf16, #tpu.memory_space<vmem>>, %arg2: memref<128x128xbf16, #tpu.memory_space<vmem>>, %arg3: memref<1x128xf32, #tpu.memory_space<vmem>>, %arg4: memref<1x128xf32, #tpu.memory_space<vmem>>, %arg5: memref<1x128xf32, #tpu.memory_space<vmem>>, %arg6: memref<1x128xf32, #tpu.memory_space<vmem>>, %arg7: memref<128x128xbf16, #tpu.memory_space<vmem>>, %arg8: memref<1x2x128xf32, #tpu.memory_space<vmem>>) attributes {dimension_semantics = [#tpu.dimension_semantics<parallel>], iteration_bounds = array<i64: 1>, scalar_prefetch = 0 : i64, scratch_operands = 0 : i64, tpu.core_type = #tpu.core_type<tc>, window_params = [{transform_indices = @transform_0, window_bounds = array<i64: 128, 128>}, {pipeline_mode = #tpu.pipeline_mode<synchronous>, transform_indices = @transform_1, window_bounds = array<i64: 128, 128>}, {pipeline_mode = #tpu.pipeline_mode<synchronous>, transform_indices = @transform_2, window_bounds = array<i64: 1, 128>}, {pipeline_mode = #tpu.pipeline_mode<synchronous>, transform_indices = @transform_3, window_bounds = array<i64: 1, 128>}, {pipeline_mode = #tpu.pipeline_mode<synchronous>, transform_indices = @transform_4, window_bounds = array<i64: 1, 128>}, {pipeline_mode = #tpu.pipeline_mode<synchronous>, transform_indices = @transform_5, window_bounds = array<i64: 1, 128>}, {transform_indices = @transform_6, window_bounds = array<i64: 128, 128>}, {transform_indices = @transform_7, window_bounds = array<i64: 1, 2, 128>}]} {
    %c0 = arith.constant 0 : index
    %c0_0 = arith.constant 0 : index
    %0 = vector.load %arg6[%c0, %c0_0] : memref<1x128xf32, #tpu.memory_space<vmem>>, vector<1x128xf32>
    %c0_1 = arith.constant 0 : index
    %c0_2 = arith.constant 0 : index
    %1 = vector.load %arg3[%c0_1, %c0_2] : memref<1x128xf32, #tpu.memory_space<vmem>>, vector<1x128xf32>
    %2 = arith.mulf %0, %1 : vector<1x128xf32>
    %c0_3 = arith.constant 0 : index
    %c0_4 = arith.constant 0 : index
    %3 = vector.load %arg4[%c0_3, %c0_4] : memref<1x128xf32, #tpu.memory_space<vmem>>, vector<1x128xf32>
    %c0_5 = arith.constant 0 : index
    %c0_6 = arith.constant 0 : index
    %4 = vector.load %arg5[%c0_5, %c0_6] : memref<1x128xf32, #tpu.memory_space<vmem>>, vector<1x128xf32>
    %5 = arith.mulf %4, %2 : vector<1x128xf32>
    %6 = arith.subf %3, %5 : vector<1x128xf32>
    %c0_7 = arith.constant 0 : index
    %c0_8 = arith.constant 0 : index
    %7 = vector.load %arg1[%c0_7, %c0_8] : memref<128x128xbf16, #tpu.memory_space<vmem>>, vector<128x128xbf16>
    %8 = arith.extf %7 : vector<128x128xbf16> to vector<128x128xf32>
    %9 = vector.broadcast %2 : vector<1x128xf32> to vector<128x128xf32>
    %10 = arith.mulf %8, %9 : vector<128x128xf32>
    %11 = vector.broadcast %6 : vector<1x128xf32> to vector<128x128xf32>
    %12 = arith.addf %10, %11 : vector<128x128xf32>
    %cst = arith.constant 0.000000e+00 : f32
    %13 = vector.broadcast %cst : f32 to vector<128x128xf32>
    %14 = arith.maximumf %12, %13 : vector<128x128xf32>
    %15 = arith.truncf %14 : vector<128x128xf32> to vector<128x128xbf16>
    %c0_9 = arith.constant 0 : index
    %c0_10 = arith.constant 0 : index
    %16 = vector.load %arg2[%c0_9, %c0_10] : memref<128x128xbf16, #tpu.memory_space<vmem>>, vector<128x128xbf16>
    %cst_11 = arith.constant dense<0.000000e+00> : vector<128x128xf32>
    %17 = tpu.matmul %15, %16, %cst_11 {dimension_numbers = #tpu.dot_dimension_numbers<[1], [0], [0], [1], [0, 0, 1, 1], [], []>} : vector<128x128xbf16>, vector<128x128xbf16>, vector<128x128xf32> -> vector<128x128xf32>
    %18 = arith.truncf %17 : vector<128x128xf32> to vector<128x128xbf16>
    %c0_12 = arith.constant 0 : index
    %c0_13 = arith.constant 0 : index
    %19 = vector.load %arg7[%c0_12, %c0_13] : memref<128x128xbf16, #tpu.memory_space<vmem>>, vector<128x128xbf16>
    tpu.vector_store %arg7[%c0_12, %c0_13], %18 {strides = array<i32>} : memref<128x128xbf16, #tpu.memory_space<vmem>>, vector<128x128xbf16>,
    %cst_14 = arith.constant dense<0.000000e+00> : vector<128xf32>
    %20 = vector.multi_reduction <add>, %17, %cst_14 [0] : vector<128x128xf32> to vector<128xf32>
    %21 = vector.shape_cast %20 : vector<128xf32> to vector<1x128xf32>
    %22 = arith.mulf %17, %17 : vector<128x128xf32>
    %cst_15 = arith.constant dense<0.000000e+00> : vector<128xf32>
    %23 = vector.multi_reduction <add>, %22, %cst_15 [0] : vector<128x128xf32> to vector<128xf32>
    %24 = vector.shape_cast %23 : vector<128xf32> to vector<1x128xf32>
    %25 = tpu.concatenate %21, %24 in 0 : vector<1x128xf32>, vector<1x128xf32> -> vector<2x128xf32>
    %26 = vector.shape_cast %25 : vector<2x128xf32> to vector<1x2x128xf32>
    %c0_16 = arith.constant 0 : index
    %c0_17 = arith.constant 0 : index
    %c0_18 = arith.constant 0 : index
    %27 = vector.load %arg8[%c0_16, %c0_17, %c0_18] : memref<1x2x128xf32, #tpu.memory_space<vmem>>, vector<1x2x128xf32>
    tpu.vector_store %arg8[%c0_16, %c0_17, %c0_18], %26 {strides = array<i32>} : memref<1x2x128xf32, #tpu.memory_space<vmem>>, vector<1x2x128xf32>,
    return
  }
  func.func @transform_0(%arg0: i32) -> (i32, i32) {
    %c0_i32 = arith.constant 0 : i32
    %c0_i32_0 = arith.constant 0 : i32
    return %arg0, %c0_i32 : i32, i32
  }
  func.func @transform_1(%arg0: i32) -> (i32, i32) {
    %c0_i32 = arith.constant 0 : i32
    %c0_i32_0 = arith.constant 0 : i32
    %c0_i32_1 = arith.constant 0 : i32
    return %c0_i32, %c0_i32_0 : i32, i32
  }
  func.func @transform_2(%arg0: i32) -> (i32, i32) {
    %c0_i32 = arith.constant 0 : i32
    %c0_i32_0 = arith.constant 0 : i32
    %c0_i32_1 = arith.constant 0 : i32
    return %c0_i32, %c0_i32_0 : i32, i32
  }
  func.func @transform_3(%arg0: i32) -> (i32, i32) {
    %c0_i32 = arith.constant 0 : i32
    %c0_i32_0 = arith.constant 0 : i32
    %c0_i32_1 = arith.constant 0 : i32
    return %c0_i32, %c0_i32_0 : i32, i32
  }
  func.func @transform_4(%arg0: i32) -> (i32, i32) {
    %c0_i32 = arith.constant 0 : i32
    %c0_i32_0 = arith.constant 0 : i32
    %c0_i32_1 = arith.constant 0 : i32
    return %c0_i32, %c0_i32_0 : i32, i32
  }
  func.func @transform_5(%arg0: i32) -> (i32, i32) {
    %c0_i32 = arith.constant 0 : i32
    %c0_i32_0 = arith.constant 0 : i32
    %c0_i32_1 = arith.constant 0 : i32
    return %c0_i32, %c0_i32_0 : i32, i32
  }
  func.func @transform_6(%arg0: i32) -> (i32, i32) {
    %c0_i32 = arith.constant 0 : i32
    %c0_i32_0 = arith.constant 0 : i32
    return %arg0, %c0_i32 : i32, i32
  }
  func.func @transform_7(%arg0: i32) -> (i32, i32, i32) {
    %c0_i32 = arith.constant 0 : i32
    %c0_i32_0 = arith.constant 0 : i32
    %c0_i32_1 = arith.constant 0 : i32
    return %arg0, %c0_i32, %c0_i32_0 : i32, i32, i32
  }
}

module attributes {stable_mosaic.version = 11 : i64} {
  func.func @_bn_add_relu_nchw_kernel(%arg0: i32, %arg1: memref<64x128xbf16, #tpu.memory_space<vmem>>, %arg2: memref<1x32x64xf32, #tpu.memory_space<vmem>>, %arg3: memref<1x128xf32, #tpu.memory_space<vmem>>, %arg4: memref<1x128xf32, #tpu.memory_space<vmem>>, %arg5: memref<1x128xf32, #tpu.memory_space<vmem>>, %arg6: memref<1x128xf32, #tpu.memory_space<vmem>>, %arg7: memref<1x32x64xf32, #tpu.memory_space<vmem>>) attributes {dimension_semantics = [#tpu.dimension_semantics<parallel>], iteration_bounds = array<i64: 2>, scalar_prefetch = 0 : i64, scratch_operands = 0 : i64, tpu.core_type = #tpu.core_type<tc>, window_params = [{transform_indices = @transform_0, window_bounds = array<i64: 64, 128>}, {transform_indices = @transform_1, window_bounds = array<i64: 1, 32, 64>}, {pipeline_mode = #tpu.pipeline_mode<synchronous>, transform_indices = @transform_2, window_bounds = array<i64: 1, 128>}, {pipeline_mode = #tpu.pipeline_mode<synchronous>, transform_indices = @transform_3, window_bounds = array<i64: 1, 128>}, {pipeline_mode = #tpu.pipeline_mode<synchronous>, transform_indices = @transform_4, window_bounds = array<i64: 1, 128>}, {pipeline_mode = #tpu.pipeline_mode<synchronous>, transform_indices = @transform_5, window_bounds = array<i64: 1, 128>}, {transform_indices = @transform_6, window_bounds = array<i64: 1, 32, 64>}]} {
    %c0 = arith.constant 0 : index
    %c0_0 = arith.constant 0 : index
    %0 = vector.load %arg6[%c0, %c0_0] : memref<1x128xf32, #tpu.memory_space<vmem>>, vector<1x128xf32>
    %c0_1 = arith.constant 0 : index
    %c0_2 = arith.constant 0 : index
    %1 = vector.load %arg3[%c0_1, %c0_2] : memref<1x128xf32, #tpu.memory_space<vmem>>, vector<1x128xf32>
    %2 = arith.mulf %0, %1 : vector<1x128xf32>
    %c0_3 = arith.constant 0 : index
    %c0_4 = arith.constant 0 : index
    %3 = vector.load %arg4[%c0_3, %c0_4] : memref<1x128xf32, #tpu.memory_space<vmem>>, vector<1x128xf32>
    %c0_5 = arith.constant 0 : index
    %c0_6 = arith.constant 0 : index
    %4 = vector.load %arg5[%c0_5, %c0_6] : memref<1x128xf32, #tpu.memory_space<vmem>>, vector<1x128xf32>
    %5 = arith.mulf %4, %2 : vector<1x128xf32>
    %6 = arith.subf %3, %5 : vector<1x128xf32>
    %c0_7 = arith.constant 0 : index
    %c0_8 = arith.constant 0 : index
    %7 = vector.load %arg1[%c0_7, %c0_8] : memref<64x128xbf16, #tpu.memory_space<vmem>>, vector<64x128xbf16>
    %8 = arith.extf %7 : vector<64x128xbf16> to vector<64x128xf32>
    %9 = vector.broadcast %2 : vector<1x128xf32> to vector<64x128xf32>
    %10 = arith.mulf %8, %9 : vector<64x128xf32>
    %11 = vector.broadcast %6 : vector<1x128xf32> to vector<64x128xf32>
    %12 = arith.addf %10, %11 : vector<64x128xf32>
    %13 = tpu.transpose %12, [1, 0] : vector<64x128xf32> -> vector<128x64xf32>
    %14 = vector.extract_strided_slice %13 {offsets = [0, 0], sizes = [32, 64], strides = [1, 1]} : vector<128x64xf32> to vector<32x64xf32>
    %c0_9 = arith.constant 0 : index
    %c0_10 = arith.constant 0 : index
    %c0_11 = arith.constant 0 : index
    %15 = vector.load %arg2[%c0_9, %c0_10, %c0_11] : memref<1x32x64xf32, #tpu.memory_space<vmem>>, vector<1x32x64xf32>
    %16 = vector.shape_cast %15 : vector<1x32x64xf32> to vector<32x64xf32>
    %17 = arith.addf %14, %16 : vector<32x64xf32>
    %cst = arith.constant 0.000000e+00 : f32
    %18 = vector.broadcast %cst : f32 to vector<32x64xf32>
    %19 = arith.maximumf %17, %18 : vector<32x64xf32>
    %c0_12 = arith.constant 0 : index
    %c0_13 = arith.constant 0 : index
    %c0_14 = arith.constant 0 : index
    %20 = vector.load %arg7[%c0_12, %c0_13, %c0_14] : memref<1x32x64xf32, #tpu.memory_space<vmem>>, vector<1x32x64xf32>
    %21 = vector.shape_cast %20 : vector<1x32x64xf32> to vector<32x64xf32>
    %22 = vector.shape_cast %19 : vector<32x64xf32> to vector<1x32x64xf32>
    tpu.vector_store %arg7[%c0_12, %c0_13, %c0_14], %22 {strides = array<i32>} : memref<1x32x64xf32, #tpu.memory_space<vmem>>, vector<1x32x64xf32>,
    return
  }
  func.func @transform_0(%arg0: i32) -> (i32, i32) {
    %c0_i32 = arith.constant 0 : i32
    %c0_i32_0 = arith.constant 0 : i32
    return %arg0, %c0_i32 : i32, i32
  }
  func.func @transform_1(%arg0: i32) -> (i32, i32, i32) {
    %c0_i32 = arith.constant 0 : i32
    %c0_i32_0 = arith.constant 0 : i32
    %c0_i32_1 = arith.constant 0 : i32
    return %arg0, %c0_i32, %c0_i32_0 : i32, i32, i32
  }
  func.func @transform_2(%arg0: i32) -> (i32, i32) {
    %c0_i32 = arith.constant 0 : i32
    %c0_i32_0 = arith.constant 0 : i32
    %c0_i32_1 = arith.constant 0 : i32
    return %c0_i32, %c0_i32_0 : i32, i32
  }
  func.func @transform_3(%arg0: i32) -> (i32, i32) {
    %c0_i32 = arith.constant 0 : i32
    %c0_i32_0 = arith.constant 0 : i32
    %c0_i32_1 = arith.constant 0 : i32
    return %c0_i32, %c0_i32_0 : i32, i32
  }
  func.func @transform_4(%arg0: i32) -> (i32, i32) {
    %c0_i32 = arith.constant 0 : i32
    %c0_i32_0 = arith.constant 0 : i32
    %c0_i32_1 = arith.constant 0 : i32
    return %c0_i32, %c0_i32_0 : i32, i32
  }
  func.func @transform_5(%arg0: i32) -> (i32, i32) {
    %c0_i32 = arith.constant 0 : i32
    %c0_i32_0 = arith.constant 0 : i32
    %c0_i32_1 = arith.constant 0 : i32
    return %c0_i32, %c0_i32_0 : i32, i32
  }
  func.func @transform_6(%arg0: i32) -> (i32, i32, i32) {
    %c0_i32 = arith.constant 0 : i32
    %c0_i32_0 = arith.constant 0 : i32
    %c0_i32_1 = arith.constant 0 : i32
    return %arg0, %c0_i32, %c0_i32_0 : i32, i32, i32
  }
}

</mosaic_0001>

<bundles_post_ra>
// kernel: bottleneck_forward.4
= control target key start
LH: loop header
LB: loop body
LE: loop exit
PB: predicated region body
PF: predicated region fallthrough
CT: control target
= control target key end

     0   :  { %vm377_vm0 = vcmask 1040384   ;;  %s658_s1 = inlined_call_operand.vmem [shape: bf16[128,128], index: 1, kind: input, shape index: {}]   ;;  %s659_s0 = inlined_call_operand.vmem [shape: bf16[128,128], index: 0, kind: input, shape index: {}]   ;;  %s660_s2 = inlined_call_operand.vmem [shape: bf16[128,128], index: 2, kind: output, shape index: {0}]   ;;  %s661_s3 = inlined_call_operand.vmem [shape: f32[1,2,128], index: 3, kind: output, shape index: {1}]  }
   0x1   :  { %v547_v0 = vld [vmem:[%s658_s1] sm:$0xff]   ;;  %v548_v1 = vld [vmem:[%s658_s1 + $0x8] sm:$0xff]   ;;  %v549_v2 = vld [vmem:[%s658_s1 + $0x10] sm:$0xff]  }
   0x2   :  { %499 = vmatprep.subr.bf16.mxu0 %v547_v0  ;;  %531 = vmatprep.subr.bf16.mxu1 %v547_v0  ;;  %v550_v3 = vld [vmem:[%s658_s1 + $0x18] sm:$0xff]   ;;  %v555_v4 = vld [vmem:[%s659_s0] sm:$0xff]   ;;  %v552_v7 = vld [vmem:[%s658_s1 + $0x28] sm:$0xff]  }
   0x3   :  { %500 = vmatpush3.bf16.msra.mxu0 %v547_v0  ;;  %539 = vmatpush3.bf16.msra.mxu1 %v547_v0  ;;  %v551_v5 = vld [vmem:[%s658_s1 + $0x20] sm:$0xff]   ;;  %v553_v8 = vld [vmem:[%s658_s1 + $0x30] sm:$0xff]   ;;  %v554_v9 = vld [vmem:[%s658_s1 + $0x38] sm:$0xff]  }
   0x4   :  { %501 = vmatprep.subr.bf16.mxu0 %v548_v1  ;;  %532 = vmatprep.subr.bf16.mxu1 %v548_v1  ;;  %v559_v6 = vld [vmem:[%s659_s0 + $0x20] sm:$0xff]   ;;  %v556_v10 = vld [vmem:[%s659_s0 + $0x8] sm:$0xff]   ;;  %v557_v12 = vld [vmem:[%s659_s0 + $0x10] sm:$0xff]  }
   0x5   :  { %515 = vmatprep.mubr.bf16.mxu0 %v555_v4  ;;  %523 = vmatprep.mubr.bf16.mxu1 %v559_v6  ;;  %v560_v11 = vld [vmem:[%s659_s0 + $0x28] sm:$0xff]   ;;  %v561_v13 = vld [vmem:[%s659_s0 + $0x30] sm:$0xff]   ;;  %v558_v14 = vld [vmem:[%s659_s0 + $0x18] sm:$0xff]  }
   0x6   :  { %v562_v15 = vld [vmem:[%s659_s0 + $0x38] sm:$0xff]  }
   0x7   :  { %502 = vmatpush3.bf16.msra.mxu0 %v548_v1  ;;  %540 = vmatpush3.bf16.msra.mxu1 %v548_v1 }
   0x8   :  { %503 = vmatprep.subr.bf16.mxu0 %v549_v2  ;;  %533 = vmatprep.subr.bf16.mxu1 %v549_v2 }
   0xb   :  { %504 = vmatpush3.bf16.msra.mxu0 %v549_v2  ;;  %541 = vmatpush3.bf16.msra.mxu1 %v549_v2 }
   0xc   :  { %505 = vmatprep.subr.bf16.mxu0 %v550_v3  ;;  %534 = vmatprep.subr.bf16.mxu1 %v550_v3 }
   0xf   :  { %506 = vmatpush3.bf16.msra.mxu0 %v550_v3  ;;  %542 = vmatpush3.bf16.msra.mxu1 %v550_v3 }
  0x10   :  { %507 = vmatprep.subr.bf16.mxu0 %v551_v5  ;;  %535 = vmatprep.subr.bf16.mxu1 %v551_v5 }
  0x13   :  { %508 = vmatpush3.bf16.msra.mxu0 %v551_v5  ;;  %543 = vmatpush3.bf16.msra.mxu1 %v551_v5 }
  0x14   :  { %509 = vmatprep.subr.bf16.mxu0 %v552_v7  ;;  %536 = vmatprep.subr.bf16.mxu1 %v552_v7 }
  0x17   :  { %510 = vmatpush3.bf16.msra.mxu0 %v552_v7  ;;  %544 = vmatpush3.bf16.msra.mxu1 %v552_v7 }
  0x18   :  { %511 = vmatprep.subr.bf16.mxu0 %v553_v8  ;;  %537 = vmatprep.subr.bf16.mxu1 %v553_v8 }
  0x1b   :  { %512 = vmatpush3.bf16.msra.mxu0 %v553_v8  ;;  %545 = vmatpush3.bf16.msra.mxu1 %v553_v8 }
  0x1c   :  { %513 = vmatprep.subr.bf16.mxu0 %v554_v9  ;;  %538 = vmatprep.subr.bf16.mxu1 %v554_v9 }
  0x1f   :  { %514 = vmatpush3.bf16.msra.mxu0 %v554_v9  ;;  %546 = vmatpush3.bf16.msra.mxu1 %v554_v9 }
  0x22   :  { %516 = vmatmul.mubr.bf16.vlgmr.msra.gmra.mrb[0].mxu0 %v556_v10  ;;  %524 = vmatmul.mubr.bf16.vlgmr.msra.gmra.mrb[0].mxu1 %v560_v11 }
  0x23   :  { %519 = vmatprep.mubr.bf16.mxu0 %v557_v12  ;;  %527 = vmatprep.mubr.bf16.mxu1 %v561_v13 }
  0x2a   :  { %520 = vmatmul.mubr.bf16.gmra.mrb[4].mxu0 %v558_v14  ;;  %528 = vmatmul.mubr.bf16.gmra.mrb[4].mxu1 %v562_v15 }
  0xf5   :  { %v517_v16 = vpop.f32.mrb[0].mxu0  ;;  %v525_v17 = vpop.f32.mrb[0].mxu1 }
  0xf6   :  { %v176_v18 = vpop.f32.mrb[1].mxu0  ;;  %v208_v19 = vpop.f32.mrb[1].mxu1  ;;  %v342_v31 = vmul.f32 %v517_v16, %v517_v16  ;;  %v350_v3 = vmul.f32 %v525_v17, %v525_v17 }
  0xf7   :  { %v518_v20 = vpop.f32.mrb[2].mxu0  ;;  %v526_v21 = vpop.f32.mrb[2].mxu1  ;;  %v340_v22 = vmul.f32 %v176_v18, %v176_v18  ;;  %v348_v61 = vmul.f32 %v208_v19, %v208_v19 }
  0xf8   :  { %v444_v23 = vpack.c.bf16 %v518_v20, %v517_v16  ;;  %v179_v24 = vpop.f32.mrb[3].mxu0  ;;  %v464_v25 = vpack.c.bf16 %v526_v21, %v525_v17  ;;  %v211_v26 = vpop.f32.mrb[3].mxu1  ;;  %v343_v34 = vmul.f32 %v518_v20, %v518_v20  ;;  %v351_v6 = vmul.f32 %v526_v21, %v526_v21 }
  0xf9   :  { %v439_v27 = vpack.c.bf16 %v179_v24, %v176_v18  ;;  %v319_v28 = vadd.f32 %v179_v24, %v176_v18  ;;  %v341_v29 = vmul.f32 %v179_v24, %v179_v24  ;;  %v459_v30 = vpack.c.bf16 %v211_v26, %v208_v19 }
  0xfa   :  { %476 = vst [vmem:[%s660_s2 + $0x8] sm:$0xff] %v444_v23   ;;  %480 = vst [vmem:[%s660_s2 + $0x28] sm:$0xff] %v464_v25   ;;  %v349_v2 = vmul.f32 %v211_v26, %v211_v26 }
  0xfb   :  { %440 = vst [vmem:[%s660_s2] sm:$0xff] %v439_v27   ;;  %v320_v32 = vadd.f32 %v517_v16, %v319_v28  ;;  %v356_v33 = vadd.f32 %v341_v29, %v340_v22  ;;  %479 = vst [vmem:[%s660_s2 + $0x20] sm:$0xff] %v459_v30  }
  0xfd   :  { %v357_v35 = vadd.f32 %v356_v33, %v342_v31  ;;  %v521_v36 = vpop.f32.mrb[4].mxu0  ;;  %v321_v37 = vadd.f32 %v518_v20, %v320_v32  ;;  %v529_v38 = vpop.f32.mrb[4].mxu1 }
  0xfe   :  { %v192_v39 = vpop.f32.mrb[5].mxu0  ;;  %v224_v40 = vpop.f32.mrb[5].mxu1  ;;  %v346_v55 = vmul.f32 %v521_v36, %v521_v36  ;;  %v354_v15 = vmul.f32 %v529_v38, %v529_v38 }
  0xff   :  { %v322_v41 = vadd.f32 %v321_v37, %v192_v39  ;;  %v344_v42 = vmul.f32 %v192_v39, %v192_v39  ;;  %v358_v43 = vadd.f32 %v357_v35, %v343_v34  ;;  %v522_v44 = vpop.f32.mrb[6].mxu0  ;;  %v530_v45 = vpop.f32.mrb[6].mxu1  ;;  %v352_v9 = vmul.f32 %v224_v40, %v224_v40 }
 0x100   :  { %v454_v46 = vpack.c.bf16 %v522_v44, %v521_v36  ;;  %v195_v47 = vpop.f32.mrb[7].mxu0  ;;  %v474_v48 = vpack.c.bf16 %v530_v45, %v529_v38  ;;  %v227_v49 = vpop.f32.mrb[7].mxu1  ;;  %v347_v58 = vmul.f32 %v522_v44, %v522_v44 }
 0x101   :  { %v359_v50 = vadd.f32 %v358_v43, %v344_v42  ;;  %v449_v51 = vpack.c.bf16 %v195_v47, %v192_v39  ;;  %v323_v52 = vadd.f32 %v322_v41, %v195_v47  ;;  %v345_v53 = vmul.f32 %v195_v47, %v195_v47 }
 0x102   :  { %478 = vst [vmem:[%s660_s2 + $0x18] sm:$0xff] %v454_v46   ;;  %482 = vst [vmem:[%s660_s2 + $0x38] sm:$0xff] %v474_v48   ;;  %v469_v54 = vpack.c.bf16 %v227_v49, %v224_v40  ;;  %v353_v14 = vmul.f32 %v227_v49, %v227_v49 }
 0x103   :  { %477 = vst [vmem:[%s660_s2 + $0x10] sm:$0xff] %v449_v51   ;;  %v324_v56 = vadd.f32 %v521_v36, %v323_v52  ;;  %v360_v57 = vadd.f32 %v359_v50, %v345_v53 }
 0x104   :  { %481 = vst [vmem:[%s660_s2 + $0x30] sm:$0xff] %v469_v54  }
 0x105   :  { %v361_v59 = vadd.f32 %v360_v57, %v346_v55  ;;  %v325_v60 = vadd.f32 %v522_v44, %v324_v56 }
 0x107   :  { %v326_v62 = vadd.f32 %v325_v60, %v208_v19  ;;  %v362_v63 = vadd.f32 %v361_v59, %v347_v58  ;;  %v355_v19 = vmul.f32 %v530_v45, %v530_v45 }
 0x109   :  { %v363_v0 = vadd.f32 %v362_v63, %v348_v61  ;;  %v327_v1 = vadd.f32 %v326_v62, %v211_v26 }
 0x10b   :  { %v328_v4 = vadd.f32 %v525_v17, %v327_v1  ;;  %v364_v5 = vadd.f32 %v363_v0, %v349_v2 }
 0x10d   :  { %v365_v7 = vadd.f32 %v364_v5, %v350_v3  ;;  %v329_v8 = vadd.f32 %v526_v21, %v328_v4 }
 0x10f   :  { %v330_v10 = vadd.f32 %v329_v8, %v224_v40  ;;  %v366_v11 = vadd.f32 %v365_v7, %v351_v6 }
 0x111   :  { %v367_v12 = vadd.f32 %v366_v11, %v352_v9  ;;  %v331_v13 = vadd.f32 %v330_v10, %v227_v49 }
 0x113   :  { %v332_v16 = vadd.f32 %v529_v38, %v331_v13  ;;  %v368_v18 = vadd.f32 %v367_v12, %v353_v14 }
 0x115   :  { %v333_v20 = vadd.f32 %v530_v45, %v332_v16  ;;  %v369_v22 = vadd.f32 %v368_v18, %v354_v15 }
 0x117   :  { %v334_v23 = vrot.slane %v333_v20, 4  ;;  %v370_v24 = vadd.f32 %v369_v22, %v355_v19 }
 0x119   :  { %v335_v25 = vadd.f32 %v334_v23, %v333_v20  ;;  %v371_v17 = vrot.slane %v370_v24, 4 }
 0x11b   :  { %v336_v26 = vrot.slane %v335_v25, 2  ;;  %v372_v27 = vadd.f32 %v371_v17, %v370_v24 }
 0x11d   :  { %v337_v28 = vadd.f32 %v336_v26, %v335_v25  ;;  %v373_v21 = vrot.slane %v372_v27, 2 }
 0x11f   :  { %v338_v29 = vrot.slane %v337_v28, 1  ;;  %v374_v30 = vadd.f32 %v373_v21, %v372_v27 }
 0x121   :  { %v375_v31 = vrot.slane %v374_v30, 1  ;;  %v339_v32 = vadd.f32 %v338_v29, %v337_v28 }
 0x123   :  { %v376_v33 = vadd.f32 %v375_v31, %v374_v30 }
 0x125   :  { %v378_v34 = vsel %vm377_vm0, %v339_v32, %v376_v33 }
 0x126   :  { %379 = vst [vmem:[%s661_s3] sm:$0x3] %v378_v34 }

// kernel: bottleneck_forward.7
= control target key start
LH: loop header
LB: loop body
LE: loop exit
PB: predicated region body
PF: predicated region fallthrough
CT: control target
= control target key end

     0   :  { %s527_s21 = smov 0   ;;  %s568_s0 = inlined_call_operand.vmem [shape: bf16[128,128], index: 0, kind: input, shape index: {}]   ;;  %s569_s1 = inlined_call_operand.vmem [shape: f32[2,32,64], index: 1, kind: input, shape index: {}]   ;;  %s570_s2 = inlined_call_operand.vmem [shape: f32[1,128], index: 2, kind: input, shape index: {}]   ;;  %s571_s3 = inlined_call_operand.vmem [shape: f32[1,128], index: 3, kind: input, shape index: {}]   ;;  %s572_s4 = inlined_call_operand.vmem [shape: f32[1,128], index: 4, kind: input, shape index: {}]   ;;  %s573_s5 = inlined_call_operand.vmem [shape: f32[1,128], index: 5, kind: input, shape index: {}]   ;;  %s574_s6 = inlined_call_operand.vmem [shape: f32[2,32,64], index: 6, kind: output, shape index: {}]  }
   0x1 LB: > { %s533_s22 = sadd.s32 4294967295, %s490_s21   ;;  %p445_p0 = scmp.ge.s32.totalorder %s490_s21, 1  ;;  %s490_s21 = sphi %s527_s21, %s16_s21  }
   0x2   : > { %p223_p1 = scmp.lt.s32.totalorder %s490_s21, 3 }
   0x4   : > { %p224_p2 = pnand %p445_p0, %p223_p1 }
   0x5   : > { %s446_s23 = sshll.u32 (!%p224_p2), %s533_s22, 3  ;;  %v274_v0 = vld [vmem:[%s573_s5] sm:$0x1] (!%p224_p2)  ;;  %v298_v2 = vlaneseq (!%p224_p2)  ;;  %p264_p4 = scmp.lt.s32.totalorder (!%p224_p2), %s533_s22, 1  ;;  %vm369_vm0 = vcmask (!%p224_p2), 523264  }
   0x6   : > { %227 = sbr.rel (%p224_p2) target bundleno = 169 (0xa9), region = 44  ;;  %v275_v1 = vld [vmem:[%s570_s2] sm:$0x1] (!%p224_p2)  ;;  %p259_p3 = scmp.lt.s32.totalorder (!%p224_p2), %s446_s23, 15 }
   0x7   : > { %v276_v3 = vmul.f32 (!%p224_p2), %v275_v1, %v274_v0  ;;  %v278_v4 = vld [vmem:[%s572_s4] sm:$0x1] (!%p224_p2)  ;;  %v299_v6 = vshrl.u32 (!%p224_p2), %v298_v2, 7 }
   0x8   : > { %v277_v5 = vld [vmem:[%s571_s3] sm:$0x1] (!%p224_p2) }
   0x9   : > { %v279_v7 = vmul.f32 (!%p224_p2), %v278_v4, %v276_v3  ;;  %v300_v8 = vsub.s32 (!%p224_p2), 0, %v299_v6 }
   0xb   : > { %v280_v9 = vsub.f32 (!%p224_p2), %v277_v5, %v279_v7  ;;  %v301_v10 = vrot.slane (!%p224_p2), %v276_v3, %v300_v8 }
   0xd   : > { %s576_s23 = smov (!%p259_p3, %s446_s23), 15  ;;  %v315_v14 = vrot.slane %v280_v9, %v300_v8  ;;  %s578_s22 = smov (!%p264_p4, %s533_s22), 1 }
   0xe   : > { %s447_s8 = sshll.u32 %s576_s23, 2  ;;  %s454_s12 = sshll.u32 %s578_s22, 5 }
   0xf   : > { %s262_s11 = scalar_lea.vmem %s568_s0, %s447_s8  ;;  %s268_s15 = scalar_lea.vmem %s569_s1, %s454_s12 }
  0x10   : > { %v457_v11 = vld [vmem:[%s262_s11] sm:$0xff]   ;;  %v472_v12 = vld [vmem:[%s262_s11 + $0x8] sm:$0xff]   ;;  %v473_v23 = vld [vmem:[%s262_s11 + $0x10] sm:$0xff]   ;;  %s273_s18 = scalar_lea.vmem %s574_s6, %s454_s12 }
  0x11   : > { %v458_v13 = vunpack.c.l.bf16 %v457_v11  ;;  %v459_v15 = vunpack.c.h.bf16 %v457_v11  ;;  %v462_v18 = vunpack.c.l.bf16 %v472_v12  ;;  %v463_v22 = vunpack.c.h.bf16 %v472_v12  ;;  %v474_v30 = vld [vmem:[%s262_s11 + $0x18] sm:$0xff]   ;;  %v357_v40 = vld [vmem:[%s268_s15] sm:$0xff]  ;;  %v358_v43 = vld [vmem:[%s268_s15 + $0x8] sm:$0xff] }
  0x12   : > { %v466_v26 = vunpack.c.l.bf16 %v473_v23  ;;  %v467_v29 = vunpack.c.h.bf16 %v473_v23  ;;  %v470_v33 = vunpack.c.l.bf16 %v474_v30  ;;  %v471_v36 = vunpack.c.h.bf16 %v474_v30  ;;  %v359_v47 = vld [vmem:[%s268_s15 + $0x10] sm:$0xff]  ;;  %v360_v51 = vld [vmem:[%s268_s15 + $0x18] sm:$0xff] }
  0x13   : > { %v303_v16 = vmul.f32 %v458_v13, %v301_v10  ;;  %v304_v17 = vmul.f32 %v459_v15, %v301_v10  ;;  %v305_v21 = vmul.f32 %v462_v18, %v301_v10  ;;  %v306_v25 = vmul.f32 %v463_v22, %v301_v10 }
  0x14   : > { %v307_v28 = vmul.f32 %v466_v26, %v301_v10  ;;  %v308_v32 = vmul.f32 %v467_v29, %v301_v10  ;;  %v309_v35 = vmul.f32 %v470_v33, %v301_v10  ;;  %v310_v38 = vmul.f32 %v471_v36, %v301_v10 }
  0x15   : > { %v317_v19 = vadd.f32 %v315_v14, %v303_v16  ;;  %v318_v20 = vadd.f32 %v315_v14, %v304_v17  ;;  %v319_v24 = vadd.f32 %v315_v14, %v305_v21  ;;  %v320_v27 = vadd.f32 %v315_v14, %v306_v25 }
  0x16   : > { %v321_v31 = vadd.f32 %v315_v14, %v307_v28  ;;  %v322_v34 = vadd.f32 %v315_v14, %v308_v32  ;;  %v323_v37 = vadd.f32 %v315_v14, %v309_v35  ;;  %v324_v39 = vadd.f32 %v315_v14, %v310_v38 }
  0x17   : > { %325 = vxpose.xlu0.b32.start [1/8] (short) (narrow) %v317_v19, 32 }
  0x1b   : > { %326 = vxpose.xlu0.b32.cont [2/8] (short) (narrow) %v318_v20, 32 }
  0x1f   : > { %327 = vxpose.xlu0.b32.cont [3/8] (short) (narrow) %v319_v24, 32 }
  0x23   : > { %328 = vxpose.xlu0.b32.cont [4/8] (short) (narrow) %v320_v27, 32 }
  0x27   : > { %329 = vxpose.xlu0.b32.cont [5/8] (short) (narrow) %v321_v31, 32 }
  0x2b   : > { %330 = vxpose.xlu0.b32.cont [6/8] (short) (narrow) %v322_v34, 32 }
  0x2f   : > { %331 = vxpose.xlu0.b32.cont [7/8] (short) (narrow) %v323_v37, 32 }
  0x33   : > { %332 = vxpose.xlu0.b32.end [8/8] (short) (narrow) %v324_v39, 32 }
  0x97   : > { %v341_v41 = vpop.trf.xlu0 }
  0x98   : > { %v361_v42 = vadd.f32 %v357_v40, %v341_v41 }
  0x9a   : > { %v365_v44 = vmax.f32 %v361_v42, 0.0 }
  0x9b   : > { %v342_v45 = vpop.trf.xlu0 }
  0x9c   : > { %370 = vst.msk [vmem:[%s273_s18] sm:$0xff] %vm369_vm0, %v365_v44  ;;  %v362_v46 = vadd.f32 %v358_v43, %v342_v45 }
  0x9e   : > { %v366_v48 = vmax.f32 %v362_v46, 0.0 }
  0x9f   : > { %v343_v49 = vpop.trf.xlu0 }
  0xa0   : > { %371 = vst.msk [vmem:[%s273_s18 + $0x8] sm:$0xff] %vm369_vm0, %v366_v48  ;;  %v363_v50 = vadd.f32 %v359_v47, %v343_v49 }
  0xa2   : > { %v367_v52 = vmax.f32 %v363_v50, 0.0 }
  0xa3   : > { %v344_v53 = vpop.trf.xlu0 }
  0xa4   : > { %372 = vst.msk [vmem:[%s273_s18 + $0x10] sm:$0xff] %vm369_vm0, %v367_v52  ;;  %v364_v54 = vadd.f32 %v360_v51, %v344_v53 }
  0xa6   : > { %v368_v55 = vmax.f32 %v364_v54, 0.0 }
  0xa8   : > { %373 = vst.msk [vmem:[%s273_s18 + $0x18] sm:$0xff] %vm369_vm0, %v368_v55 }
  0xa9 PF: > { %s16_s21 = sadd.s32 1, %s490_s21  }
  0xaa   : > { %p13_p5 = scmp.ge.s32.totalorder %s16_s21, 4  }
  0xac   :  { %15 = sbr.rel (!%p13_p5) target bundleno = 1 (0x1), region = 77 }

// kernel: bottleneck_forward.6
= control target key start
LH: loop header
LB: loop body
LE: loop exit
PB: predicated region body
PF: predicated region fallthrough
CT: control target
= control target key end

     0   :  { %v66_v0 = vlaneseq  ;;  %vm432_vm0 = vcmask 1040384   ;;  %s804_s1 = inlined_call_operand.vmem [shape: bf16[128,128], index: 1, kind: input, shape index: {}]   ;;  %s805_s2 = inlined_call_operand.vmem [shape: f32[1,128], index: 2, kind: input, shape index: {}]   ;;  %s806_s5 = inlined_call_operand.vmem [shape: f32[1,128], index: 5, kind: input, shape index: {}]   ;;  %s807_s0 = inlined_call_operand.vmem [shape: bf16[128,128], index: 0, kind: input, shape index: {}]   ;;  %s808_s4 = inlined_call_operand.vmem [shape: f32[1,128], index: 4, kind: input, shape index: {}]   ;;  %s809_s3 = inlined_call_operand.vmem [shape: f32[1,128], index: 3, kind: input, shape index: {}]   ;;  %s810_s6 = inlined_call_operand.vmem [shape: bf16[128,128], index: 6, kind: output, shape index: {0}]   ;;  %s811_s7 = inlined_call_operand.vmem [shape: f32[1,2,128], index: 7, kind: output, shape index: {1}]  }
   0x1   :  { %v633_v1 = vld [vmem:[%s804_s1] sm:$0xff]   ;;  %v634_v2 = vld [vmem:[%s804_s1 + $0x8] sm:$0xff]   ;;  %v635_v4 = vld [vmem:[%s804_s1 + $0x10] sm:$0xff]  }
   0x2   :  { %585 = vmatprep.subr.bf16.mxu0 %v633_v1  ;;  %617 = vmatprep.subr.bf16.mxu1 %v633_v1  ;;  %v67_v3 = vshrl.u32 %v66_v0, 7  ;;  %v636_v6 = vld [vmem:[%s804_s1 + $0x18] sm:$0xff]   ;;  %v26_v7 = vld [vmem:[%s806_s5] sm:$0x1]  ;;  %v555_v12 = vld [vmem:[%s807_s0 + $0x8] sm:$0xff]  }
   0x3   :  { %586 = vmatpush3.bf16.msra.mxu0 %v633_v1  ;;  %625 = vmatpush3.bf16.msra.mxu1 %v633_v1  ;;  %v27_v8 = vld [vmem:[%s805_s2] sm:$0x1]  ;;  %v556_v19 = vld [vmem:[%s807_s0 + $0x10] sm:$0xff]   ;;  %v489_v21 = vunpack.c.l.bf16 %v555_v12  ;;  %v490_v22 = vunpack.c.h.bf16 %v555_v12  ;;  %v557_v27 = vld [vmem:[%s807_s0 + $0x18] sm:$0xff]  }
   0x4   :  { %587 = vmatprep.subr.bf16.mxu0 %v634_v2  ;;  %618 = vmatprep.subr.bf16.mxu1 %v634_v2  ;;  %v68_v5 = vsub.s32 0, %v67_v3  ;;  %v28_v9 = vmul.f32 %v27_v8, %v26_v7  ;;  %v30_v10 = vld [vmem:[%s808_s4] sm:$0x1]  ;;  %v493_v29 = vunpack.c.l.bf16 %v556_v19  ;;  %v494_v30 = vunpack.c.h.bf16 %v556_v19  ;;  %v559_v32 = vld [vmem:[%s807_s0 + $0x28] sm:$0xff]   ;;  %v560_v37 = vld [vmem:[%s807_s0 + $0x30] sm:$0xff]  }
   0x5   :  { %v484_v11 = vld [vmem:[%s807_s0] sm:$0xff]   ;;  %v638_v33 = vld [vmem:[%s804_s1 + $0x28] sm:$0xff]   ;;  %v497_v36 = vunpack.c.l.bf16 %v557_v27  ;;  %v505_v44 = vunpack.c.l.bf16 %v559_v32  ;;  %v506_v45 = vunpack.c.h.bf16 %v559_v32  ;;  %v509_v48 = vunpack.c.l.bf16 %v560_v37  ;;  %v639_v50 = vld [vmem:[%s804_s1 + $0x30] sm:$0xff]  }
   0x6   :  { %v29_v13 = vld [vmem:[%s809_s3] sm:$0x1]  ;;  %v485_v14 = vunpack.c.l.bf16 %v484_v11  ;;  %v486_v15 = vunpack.c.h.bf16 %v484_v11  ;;  %v31_v17 = vmul.f32 %v30_v10, %v28_v9  ;;  %v714_v18 = vrot.slane %v28_v9, %v68_v5  ;;  %v561_v58 = vld [vmem:[%s807_s0 + $0x38] sm:$0xff]  }
   0x7   :  { %588 = vmatpush3.bf16.msra.mxu0 %v634_v2  ;;  %626 = vmatpush3.bf16.msra.mxu1 %v634_v2  ;;  %v558_v16 = vld [vmem:[%s807_s0 + $0x20] sm:$0xff]   ;;  %v510_v49 = vunpack.c.h.bf16 %v560_v37  ;;  %v498_v52 = vunpack.c.h.bf16 %v557_v27  ;;  %v640_v3 = vld [vmem:[%s804_s1 + $0x38] sm:$0xff]   ;;  %v514_v7 = vunpack.c.h.bf16 %v561_v58 }
   0x8   :  { %589 = vmatprep.subr.bf16.mxu0 %v635_v4  ;;  %619 = vmatprep.subr.bf16.mxu1 %v635_v4  ;;  %v637_v20 = vld [vmem:[%s804_s1 + $0x20] sm:$0xff]   ;;  %v501_v23 = vunpack.c.l.bf16 %v558_v16  ;;  %v32_v24 = vsub.f32 %v29_v13, %v31_v17  ;;  %v71_v25 = vmul.f32 %v485_v14, %v714_v18  ;;  %v72_v26 = vmul.f32 %v486_v15, %v714_v18 }
   0x9   :  { %v502_v28 = vunpack.c.h.bf16 %v558_v16  ;;  %v73_v34 = vmul.f32 %v489_v21, %v714_v18  ;;  %v74_v35 = vmul.f32 %v490_v22, %v714_v18  ;;  %v75_v42 = vmul.f32 %v493_v29, %v714_v18 }
   0xa   :  { %v727_v31 = vrot.slane %v32_v24, %v68_v5  ;;  %v79_v40 = vmul.f32 %v501_v23, %v714_v18  ;;  %v76_v43 = vmul.f32 %v494_v30, %v714_v18  ;;  %v77_v53 = vmul.f32 %v497_v36, %v714_v18 }
   0xb   :  { %590 = vmatpush3.bf16.msra.mxu0 %v635_v4  ;;  %627 = vmatpush3.bf16.msra.mxu1 %v635_v4  ;;  %v80_v41 = vmul.f32 %v502_v28, %v714_v18  ;;  %v81_v61 = vmul.f32 %v505_v44, %v714_v18  ;;  %v82_v62 = vmul.f32 %v506_v45, %v714_v18 }
   0xc   :  { %591 = vmatprep.subr.bf16.mxu0 %v636_v6  ;;  %620 = vmatprep.subr.bf16.mxu1 %v636_v6  ;;  %v93_v38 = vadd.f32 %v727_v31, %v71_v25  ;;  %v94_v39 = vadd.f32 %v727_v31, %v72_v26  ;;  %v95_v51 = vadd.f32 %v727_v31, %v73_v34 }
   0xd   :  { %v96_v55 = vadd.f32 %v727_v31, %v74_v35  ;;  %v101_v56 = vadd.f32 %v727_v31, %v79_v40  ;;  %v102_v57 = vadd.f32 %v727_v31, %v80_v41  ;;  %v97_v59 = vadd.f32 %v727_v31, %v75_v42 }
   0xe   :  { %v109_v46 = vmax.f32 %v93_v38, 0.0  ;;  %v110_v47 = vmax.f32 %v94_v39, 0.0  ;;  %v98_v60 = vadd.f32 %v727_v31, %v76_v43  ;;  %v83_v1 = vmul.f32 %v509_v48, %v714_v18 }
   0xf   :  { %592 = vmatpush3.bf16.msra.mxu0 %v636_v6  ;;  %628 = vmatpush3.bf16.msra.mxu1 %v636_v6  ;;  %v117_v63 = vmax.f32 %v101_v56, 0.0  ;;  %v118_v0 = vmax.f32 %v102_v57, 0.0  ;;  %v84_v2 = vmul.f32 %v510_v49, %v714_v18  ;;  %v103_v4 = vadd.f32 %v727_v31, %v81_v61 }
  0x10   :  { %593 = vmatprep.subr.bf16.mxu0 %v637_v20  ;;  %621 = vmatprep.subr.bf16.mxu1 %v637_v20  ;;  %v125_v54 = vpack.c.bf16 %v110_v47, %v109_v46  ;;  %v104_v5 = vadd.f32 %v727_v31, %v82_v62  ;;  %v513_v6 = vunpack.c.l.bf16 %v561_v58  ;;  %v78_v8 = vmul.f32 %v498_v52, %v714_v18 }
  0x11   :  { %v129_v9 = vpack.c.bf16 %v118_v0, %v117_v63  ;;  %v105_v10 = vadd.f32 %v727_v31, %v83_v1  ;;  %v106_v11 = vadd.f32 %v727_v31, %v84_v2  ;;  %v111_v12 = vmax.f32 %v95_v51, 0.0 }
  0x12   :  { %601 = vmatprep.mubr.bf16.mxu0 %v125_v54  ;;  %v112_v13 = vmax.f32 %v96_v55, 0.0  ;;  %v113_v14 = vmax.f32 %v97_v59, 0.0  ;;  %v114_v15 = vmax.f32 %v98_v60, 0.0  ;;  %v119_v16 = vmax.f32 %v103_v4, 0.0 }
  0x13   :  { %594 = vmatpush3.bf16.msra.mxu0 %v637_v20  ;;  %629 = vmatpush3.bf16.msra.mxu1 %v637_v20  ;;  %v120_v17 = vmax.f32 %v104_v5, 0.0  ;;  %v85_v19 = vmul.f32 %v513_v6, %v714_v18  ;;  %v86_v20 = vmul.f32 %v514_v7, %v714_v18  ;;  %v121_v21 = vmax.f32 %v105_v10, 0.0 }
  0x14   :  { %595 = vmatprep.subr.bf16.mxu0 %v638_v33  ;;  %622 = vmatprep.subr.bf16.mxu1 %v638_v33  ;;  %v122_v22 = vmax.f32 %v106_v11, 0.0  ;;  %v126_v23 = vpack.c.bf16 %v112_v13, %v111_v12  ;;  %v99_v24 = vadd.f32 %v727_v31, %v77_v53  ;;  %v100_v25 = vadd.f32 %v727_v31, %v78_v8 }
  0x15   :  { %609 = vmatprep.mubr.bf16.mxu1 %v129_v9  ;;  %v127_v26 = vpack.c.bf16 %v114_v15, %v113_v14  ;;  %v130_v27 = vpack.c.bf16 %v120_v17, %v119_v16  ;;  %v107_v28 = vadd.f32 %v727_v31, %v85_v19  ;;  %v108_v29 = vadd.f32 %v727_v31, %v86_v20 }
  0x16   :  { %v131_v30 = vpack.c.bf16 %v122_v22, %v121_v21  ;;  %v115_v18 = vmax.f32 %v99_v24, 0.0  ;;  %v116_v32 = vmax.f32 %v100_v25, 0.0 }
  0x17   :  { %596 = vmatpush3.bf16.msra.mxu0 %v638_v33  ;;  %630 = vmatpush3.bf16.msra.mxu1 %v638_v33  ;;  %v123_v33 = vmax.f32 %v107_v28, 0.0  ;;  %v124_v34 = vmax.f32 %v108_v29, 0.0 }
  0x18   :  { %597 = vmatprep.subr.bf16.mxu0 %v639_v50  ;;  %623 = vmatprep.subr.bf16.mxu1 %v639_v50  ;;  %v128_v35 = vpack.c.bf16 %v116_v32, %v115_v18 }
  0x19   :  { %v132_v36 = vpack.c.bf16 %v124_v34, %v123_v33 }
  0x1b   :  { %598 = vmatpush3.bf16.msra.mxu0 %v639_v50  ;;  %631 = vmatpush3.bf16.msra.mxu1 %v639_v50 }
  0x1c   :  { %599 = vmatprep.subr.bf16.mxu0 %v640_v3  ;;  %624 = vmatprep.subr.bf16.mxu1 %v640_v3 }
  0x1f   :  { %600 = vmatpush3.bf16.msra.mxu0 %v640_v3  ;;  %632 = vmatpush3.bf16.msra.mxu1 %v640_v3 }
  0x22   :  { %602 = vmatmul.mubr.bf16.vlgmr.msra.gmra.mrb[0].mxu0 %v126_v23  ;;  %610 = vmatmul.mubr.bf16.vlgmr.msra.gmra.mrb[0].mxu1 %v130_v27 }
  0x23   :  { %605 = vmatprep.mubr.bf16.mxu0 %v127_v26  ;;  %613 = vmatprep.mubr.bf16.mxu1 %v131_v30 }
  0x2a   :  { %606 = vmatmul.mubr.bf16.gmra.mrb[4].mxu0 %v128_v35  ;;  %614 = vmatmul.mubr.bf16.gmra.mrb[4].mxu1 %v132_v36 }
  0xf5   :  { %v603_v37 = vpop.f32.mrb[0].mxu0  ;;  %v611_v39 = vpop.f32.mrb[0].mxu1 }
  0xf6   :  { %v231_v38 = vpop.f32.mrb[1].mxu0  ;;  %v263_v41 = vpop.f32.mrb[1].mxu1  ;;  %v397_v51 = vmul.f32 %v603_v37, %v603_v37  ;;  %v405_v24 = vmul.f32 %v611_v39, %v611_v39 }
  0xf7   :  { %v604_v40 = vpop.f32.mrb[2].mxu0  ;;  %v395_v31 = vmul.f32 %v231_v38, %v231_v38  ;;  %v612_v44 = vpop.f32.mrb[2].mxu1  ;;  %v403_v17 = vmul.f32 %v263_v41, %v263_v41 }
  0xf8   :  { %v523_v42 = vpack.c.bf16 %v604_v40, %v603_v37  ;;  %v234_v43 = vpop.f32.mrb[3].mxu0  ;;  %v543_v48 = vpack.c.bf16 %v612_v44, %v611_v39  ;;  %v266_v49 = vpop.f32.mrb[3].mxu1  ;;  %v398_v54 = vmul.f32 %v604_v40, %v604_v40  ;;  %v406_v27 = vmul.f32 %v612_v44, %v612_v44 }
  0xf9   :  { %v518_v45 = vpack.c.bf16 %v234_v43, %v231_v38  ;;  %v374_v46 = vadd.f32 %v234_v43, %v231_v38  ;;  %v396_v47 = vmul.f32 %v234_v43, %v234_v43  ;;  %v538_v50 = vpack.c.bf16 %v266_v49, %v263_v41 }
  0xfa   :  { %562 = vst [vmem:[%s810_s6 + $0x8] sm:$0xff] %v523_v42   ;;  %566 = vst [vmem:[%s810_s6 + $0x28] sm:$0xff] %v543_v48   ;;  %v404_v23 = vmul.f32 %v266_v49, %v266_v49 }
  0xfb   :  { %519 = vst [vmem:[%s810_s6] sm:$0xff] %v518_v45   ;;  %v375_v52 = vadd.f32 %v603_v37, %v374_v46  ;;  %v411_v53 = vadd.f32 %v396_v47, %v395_v31  ;;  %565 = vst [vmem:[%s810_s6 + $0x20] sm:$0xff] %v538_v50  }
  0xfd   :  { %v412_v55 = vadd.f32 %v411_v53, %v397_v51  ;;  %v607_v56 = vpop.f32.mrb[4].mxu0  ;;  %v376_v57 = vadd.f32 %v604_v40, %v375_v52  ;;  %v615_v59 = vpop.f32.mrb[4].mxu1 }
  0xfe   :  { %v247_v58 = vpop.f32.mrb[5].mxu0  ;;  %v279_v0 = vpop.f32.mrb[5].mxu1  ;;  %v401_v11 = vmul.f32 %v607_v56, %v607_v56  ;;  %v409_v36 = vmul.f32 %v615_v59, %v615_v59 }
  0xff   :  { %v377_v60 = vadd.f32 %v376_v57, %v247_v58  ;;  %v399_v61 = vmul.f32 %v247_v58, %v247_v58  ;;  %v413_v62 = vadd.f32 %v412_v55, %v398_v54  ;;  %v608_v63 = vpop.f32.mrb[6].mxu0  ;;  %v616_v3 = vpop.f32.mrb[6].mxu1  ;;  %v407_v30 = vmul.f32 %v279_v0, %v279_v0 }
 0x100   :  { %v533_v1 = vpack.c.bf16 %v608_v63, %v607_v56  ;;  %v250_v2 = vpop.f32.mrb[7].mxu0  ;;  %v282_v8 = vpop.f32.mrb[7].mxu1  ;;  %v553_v9 = vpack.c.bf16 %v616_v3, %v615_v59  ;;  %v402_v14 = vmul.f32 %v608_v63, %v608_v63  ;;  %v410_v40 = vmul.f32 %v616_v3, %v616_v3 }
 0x101   :  { %v414_v4 = vadd.f32 %v413_v62, %v399_v61  ;;  %v528_v5 = vpack.c.bf16 %v250_v2, %v247_v58  ;;  %v378_v6 = vadd.f32 %v377_v60, %v250_v2  ;;  %v400_v7 = vmul.f32 %v250_v2, %v250_v2 }
 0x102   :  { %564 = vst [vmem:[%s810_s6 + $0x18] sm:$0xff] %v533_v1   ;;  %v548_v10 = vpack.c.bf16 %v282_v8, %v279_v0  ;;  %568 = vst [vmem:[%s810_s6 + $0x38] sm:$0xff] %v553_v9   ;;  %v408_v35 = vmul.f32 %v282_v8, %v282_v8 }
 0x103   :  { %563 = vst [vmem:[%s810_s6 + $0x10] sm:$0xff] %v528_v5   ;;  %v379_v12 = vadd.f32 %v607_v56, %v378_v6  ;;  %v415_v13 = vadd.f32 %v414_v4, %v400_v7 }
 0x104   :  { %567 = vst [vmem:[%s810_s6 + $0x30] sm:$0xff] %v548_v10  }
 0x105   :  { %v416_v15 = vadd.f32 %v415_v13, %v401_v11  ;;  %v380_v16 = vadd.f32 %v608_v63, %v379_v12 }
 0x107   :  { %v381_v19 = vadd.f32 %v380_v16, %v263_v41  ;;  %v417_v20 = vadd.f32 %v416_v15, %v402_v14 }
 0x109   :  { %v418_v21 = vadd.f32 %v417_v20, %v403_v17  ;;  %v382_v22 = vadd.f32 %v381_v19, %v266_v49 }
 0x10b   :  { %v383_v25 = vadd.f32 %v611_v39, %v382_v22  ;;  %v419_v26 = vadd.f32 %v418_v21, %v404_v23 }
 0x10d   :  { %v420_v28 = vadd.f32 %v419_v26, %v405_v24  ;;  %v384_v29 = vadd.f32 %v612_v44, %v383_v25 }
 0x10f   :  { %v385_v18 = vadd.f32 %v384_v29, %v279_v0  ;;  %v421_v32 = vadd.f32 %v420_v28, %v406_v27 }
 0x111   :  { %v422_v33 = vadd.f32 %v421_v32, %v407_v30  ;;  %v386_v34 = vadd.f32 %v385_v18, %v282_v8 }
 0x113   :  { %v387_v37 = vadd.f32 %v615_v59, %v386_v34  ;;  %v423_v38 = vadd.f32 %v422_v33, %v408_v35 }
 0x115   :  { %v388_v41 = vadd.f32 %v616_v3, %v387_v37  ;;  %v424_v31 = vadd.f32 %v423_v38, %v409_v36 }
 0x117   :  { %v389_v42 = vrot.slane %v388_v41, 4  ;;  %v425_v43 = vadd.f32 %v424_v31, %v410_v40 }
 0x119   :  { %v390_v45 = vadd.f32 %v389_v42, %v388_v41  ;;  %v426_v39 = vrot.slane %v425_v43, 4 }
 0x11b   :  { %v391_v46 = vrot.slane %v390_v45, 2  ;;  %v427_v47 = vadd.f32 %v426_v39, %v425_v43 }
 0x11d   :  { %v392_v48 = vadd.f32 %v391_v46, %v390_v45  ;;  %v428_v44 = vrot.slane %v427_v47, 2 }
 0x11f   :  { %v393_v49 = vrot.slane %v392_v48, 1  ;;  %v429_v50 = vadd.f32 %v428_v44, %v427_v47 }
 0x121   :  { %v430_v51 = vrot.slane %v429_v50, 1  ;;  %v394_v52 = vadd.f32 %v393_v49, %v392_v48 }
 0x123   :  { %v431_v53 = vadd.f32 %v430_v51, %v429_v50 }
 0x125   :  { %v433_v54 = vsel %vm432_vm0, %v394_v52, %v431_v53 }
 0x126   :  { %434 = vst [vmem:[%s811_s7] sm:$0x3] %v433_v54 }

// kernel: bottleneck_forward.5
= control target key start
LH: loop header
LB: loop body
LE: loop exit
PB: predicated region body
PF: predicated region fallthrough
CT: control target
= control target key end

     0   :  { %s3099_s24 = smov 0   ;;  %s3682_s0 = inlined_call_operand.vmem [shape: bf16[2,8,8,128], index: 0, kind: input, shape index: {}]   ;;  %s3683_s1 = inlined_call_operand.vmem [shape: bf16[9,128,128], index: 1, kind: input, shape index: {}]   ;;  %s3684_s2 = inlined_call_operand.vmem [shape: f32[1,128], index: 2, kind: input, shape index: {}]   ;;  %s3685_s3 = inlined_call_operand.vmem [shape: f32[1,128], index: 3, kind: input, shape index: {}]   ;;  %s3686_s4 = inlined_call_operand.vmem [shape: f32[1,128], index: 4, kind: input, shape index: {}]   ;;  %s3687_s5 = inlined_call_operand.vmem [shape: f32[1,128], index: 5, kind: input, shape index: {}]   ;;  %s3688_s6 = inlined_call_operand.vmem [shape: bf16[128,128], index: 6, kind: output, shape index: {0}]   ;;  %s3689_s7 = inlined_call_operand.vmem [shape: f32[2,2,128], index: 7, kind: output, shape index: {1}]  }
   0x1 LB: > { %s3105_s25 = sadd.s32 4294967295, %s3056_s24   ;;  %p2242_p0 = scmp.ge.s32.totalorder %s3056_s24, 1  ;;  %s3056_s24 = sphi %s3099_s24, %s18_s24  }
   0x2   : > { %p240_p1 = scmp.lt.s32.totalorder %s3056_s24, 3 }
   0x4   : > { %p241_p2 = pnand %p2242_p0, %p240_p1 }
   0x5   : > { %v2975_v0 = vld [vmem:[%s3683_s1 + $0x40] sm:$0xff] (!%p241_p2)   ;;  %v2977_v2 = vld [vmem:[%s3683_s1 + $0x48] sm:$0xff] (!%p241_p2)   ;;  %v3058_v3 = vmov (!%p241_p2), 0   ;;  %p276_p3 = scmp.lt.s32.totalorder (!%p241_p2), %s3105_s25, 1  ;;  %v2979_v5 = vld [vmem:[%s3683_s1 + $0x50] sm:$0xff] (!%p241_p2)   ;;  %v317_v7 = vlaneseq (!%p241_p2)  ;;  %vm485_vm0 = vcmask (!%p241_p2), 1043456  }
   0x6   : > { %244 = sbr.rel (%p241_p2) target bundleno = 439 (0x1b7), region = 44  ;;  %v2976_v1 = vld [vmem:[%s3683_s1 + $0x100] sm:$0xff] (!%p241_p2)   ;;  %2670 = vmatprep.subr.bf16.mxu1 (!%p241_p2), %v2975_v0  ;;  %360 = vst [vmem:[#allocation2] sm:$0xf] (!%p241_p2), %v3058_v3  ;;  %361 = vst [vmem:[#allocation2 + $0x4] sm:$0x1] (!%p241_p2), %v3058_v3 }
   0x7   : > { %362 = vst [vmem:[#allocation2 + $0x8] sm:$0xf] (!%p241_p2), %v3058_v3  ;;  %363 = vst [vmem:[#allocation2 + $0xc] sm:$0x1] (!%p241_p2), %v3058_v3  ;;  %2766 = vmatprep.subr.bf16.mxu0 (!%p241_p2), %v2976_v1  ;;  %2671 = vmatpush3.bf16.msra.mxu1 (!%p241_p2), %v2975_v0  ;;  %v2978_v4 = vld [vmem:[%s3683_s1 + $0x108] sm:$0xff] (!%p241_p2)   ;;  %v2980_v6 = vld [vmem:[%s3683_s1 + $0x110] sm:$0xff] (!%p241_p2)  }
   0x8   : > { %364 = vst [vmem:[#allocation2 + $0x10] sm:$0xf] (!%p241_p2), %v3058_v3  ;;  %365 = vst [vmem:[#allocation2 + $0x14] sm:$0x1] (!%p241_p2), %v3058_v3  ;;  %2767 = vmatpush3.bf16.msra.mxu0 (!%p241_p2), %v2976_v1  ;;  %2672 = vmatprep.subr.bf16.mxu1 (!%p241_p2), %v2977_v2  ;;  %v2981_v8 = vld [vmem:[%s3683_s1 + $0x58] sm:$0xff] (!%p241_p2)   ;;  %v318_v10 = vshrl.u32 (!%p241_p2), %v317_v7, 7 }
   0x9   : > { %366 = vst [vmem:[#allocation2 + $0x18] sm:$0xf] (!%p241_p2), %v3058_v3  ;;  %367 = vst [vmem:[#allocation2 + $0x1c] sm:$0x1] (!%p241_p2), %v3058_v3  ;;  %2768 = vmatprep.subr.bf16.mxu0 (!%p241_p2), %v2978_v4  ;;  %v2982_v9 = vld [vmem:[%s3683_s1 + $0x118] sm:$0xff] (!%p241_p2)   ;;  %v2983_v11 = vld [vmem:[%s3683_s1 + $0x60] sm:$0xff] (!%p241_p2)  }
   0xa   : > { %368 = vst [vmem:[#allocation2 + $0x20] sm:$0xf] (!%p241_p2), %v3058_v3  ;;  %369 = vst [vmem:[#allocation2 + $0x24] sm:$0x1] (!%p241_p2), %v3058_v3  ;;  %v2984_v12 = vld [vmem:[%s3683_s1 + $0x120] sm:$0xff] (!%p241_p2)   ;;  %v319_v13 = vsub.s32 (!%p241_p2), 0, %v318_v10 }
   0xb   : > { %370 = vst [vmem:[#allocation2 + $0x28] sm:$0xf] (!%p241_p2), %v3058_v3  ;;  %371 = vst [vmem:[#allocation2 + $0x2c] sm:$0x1] (!%p241_p2), %v3058_v3  ;;  %2673 = vmatpush3.bf16.msra.mxu1 (!%p241_p2), %v2977_v2  ;;  %v2985_v14 = vld [vmem:[%s3683_s1 + $0x68] sm:$0xff] (!%p241_p2)   ;;  %v2987_v26 = vld [vmem:[%s3683_s1 + $0x70] sm:$0xff] (!%p241_p2)  }
   0xc   : > { %372 = vst [vmem:[#allocation2 + $0x30] sm:$0xf] (!%p241_p2), %v3058_v3  ;;  %373 = vst [vmem:[#allocation2 + $0x34] sm:$0x1] (!%p241_p2), %v3058_v3  ;;  %2769 = vmatpush3.bf16.msra.mxu0 (!%p241_p2), %v2978_v4  ;;  %2674 = vmatprep.subr.bf16.mxu1 (!%p241_p2), %v2979_v5  ;;  %v292_v15 = vld [vmem:[%s3687_s5] sm:$0x1] (!%p241_p2) }
   0xd   : > { %374 = vst [vmem:[#allocation2 + $0x38] sm:$0xf] %v3058_v3  ;;  %375 = vst [vmem:[#allocation2 + $0x3c] sm:$0x1] %v3058_v3  ;;  %s3129_s15 = scalar_select %p276_p3, %s3105_s25, 1  ;;  %2770 = vmatprep.subr.bf16.mxu0 %v2980_v6  ;;  %v2986_v17 = vld [vmem:[%s3683_s1 + $0x128] sm:$0xff]  }
   0xe   : > { %376 = vst [vmem:[#allocation2 + $0x40] sm:$0xf] %v3058_v3  ;;  %377 = vst [vmem:[#allocation2 + $0x44] sm:$0x1] %v3058_v3  ;;  %v293_v16 = vld [vmem:[%s3684_s2] sm:$0x1] }
   0xf   : > { %378 = vst [vmem:[#allocation2 + $0x48] sm:$0xf] %v3058_v3  ;;  %379 = vst [vmem:[#allocation2 + $0x4c] sm:$0x1] %v3058_v3  ;;  %2675 = vmatpush3.bf16.msra.mxu1 %v2979_v5  ;;  %s2503_s20 = sshll.u32 %s3129_s15, 5  ;;  %v294_v18 = vmul.f32 %v293_v16, %v292_v15  ;;  %v2988_v28 = vld [vmem:[%s3683_s1 + $0x130] sm:$0xff]  }
  0x10   : > { %2771 = vmatpush3.bf16.msra.mxu0 %v2980_v6  ;;  %2676 = vmatprep.subr.bf16.mxu1 %v2981_v8  ;;  %s3147_s29 = scalar_lea.vmem %s3682_s0, %s2503_s20  ;;  %v296_v19 = vld [vmem:[%s3686_s4] sm:$0x1]  ;;  %v2989_v34 = vld [vmem:[%s3683_s1 + $0x78] sm:$0xff]   ;;  %vm486_vm1 = vsmask.f32 7938  ;;  %vm491_vm2 = vcmask 1040384  }
  0x11   : > { %2772 = vmatprep.subr.bf16.mxu0 %v2982_v9  ;;  %v2521_v20 = vld [vmem:[%s3147_s29] sm:$0xff]   ;;  %v297_v21 = vmul.f32 %v296_v19, %v292_v15  ;;  %v3168_v25 = vrot.slane %v294_v18, %v319_v13  ;;  %v2556_v29 = vld [vmem:[%s3147_s29 + $0x8] sm:$0xff]   ;;  %v2990_v35 = vld [vmem:[%s3683_s1 + $0x138] sm:$0xff]   ;;  %vm492_vm3 = vsmask.f32 256  ;;  %vm981_vm9 = vcmask 1042432  }
  0x12   : > { %v2522_v22 = vunpack.c.l.bf16 %v2521_v20  ;;  %v2523_v23 = vunpack.c.h.bf16 %v2521_v20  ;;  %v295_v24 = vld [vmem:[%s3685_s3] sm:$0x1]  ;;  %v2526_v32 = vunpack.c.l.bf16 %v2556_v29  ;;  %v2527_v36 = vunpack.c.h.bf16 %v2556_v29  ;;  %v3192_v42 = vld [vmem:[#allocation2 + $0x4] sm:$0x1]  ;;  %v488_v1 = vld [vmem:[#allocation2 + $0x8] sm:$0xf] }
  0x13   : > { %2677 = vmatpush3.bf16.msra.mxu1 %v2981_v8  ;;  %v298_v27 = vmul.f32 %v297_v21, %v293_v16  ;;  %v3187_v38 = vld [vmem:[#allocation2] sm:$0xf]  ;;  %v588_v55 = vshll.u32 %v3192_v42, 16  ;;  %vm575_vm4 = vsmask.f32 3328  ;;  %vm3214_vm5 = vmand %vm485_vm0, %vm486_vm1  ;;  %v2557_v29 = vld [vmem:[%s3147_s29 + $0x10] sm:$0xff]  }
  0x14   : > { %2773 = vmatpush3.bf16.msra.mxu0 %v2982_v9  ;;  %2678 = vmatprep.subr.bf16.mxu1 %v2983_v11  ;;  %v322_v31 = vmul.f32 %v2522_v22, %v3168_v25  ;;  %v323_v33 = vmul.f32 %v2523_v23, %v3168_v25  ;;  %v324_v39 = vmul.f32 %v2526_v32, %v3168_v25  ;;  %v579_v45 = vshrl.u32 %v3187_v38, 16  ;;  %v3202_v49 = vld [vmem:[%s3683_s1] sm:$0xff]   ;;  %v494_v2 = vld [vmem:[#allocation2 + $0xc] sm:$0x1]  ;;  %v497_v5 = vld [vmem:[#allocation2 + $0x10] sm:$0xf] }
  0x15   : > { %2774 = vmatprep.subr.bf16.mxu0 %v2984_v12  ;;  %v299_v30 = vsub.f32 %v295_v24, %v298_v27  ;;  %v325_v40 = vmul.f32 %v2527_v36, %v3168_v25  ;;  %v582_v46 = vshll.u32 %v3187_v38, 16  ;;  %v3207_v52 = vld [vmem:[%s3683_s1 + $0x140] sm:$0xff]   ;;  %v500_v6 = vld [vmem:[#allocation2 + $0x14] sm:$0x1]  ;;  %vm3220_vm6 = vmand %vm491_vm2, %vm492_vm3  ;;  %vm576_vm7 = vsmask.f32 7440 }
  0x16   : > { %v581_v58 = vrot.slane %v579_v45, 4  ;;  %v512_v23 = vld [vmem:[#allocation2 + $0x24] sm:$0x1]  ;;  %v590_v45 = vrot.slane %v588_v55, 5  ;;  %vm3246_vm8 = vmor %vm575_vm4, %vm576_vm7  ;;  %vm982_vm10 = vcmask 1046532   ;;  %s2245_s20 = sshll.u32 %s3105_s25, 3 }
  0x17   : > { %2679 = vmatpush3.bf16.msra.mxu1 %v2983_v11  ;;  %v3185_v37 = vrot.slane %v299_v30, %v319_v13  ;;  %v584_v59 = vrot.slane %v582_v46, 5  ;;  %v506_v13 = vld [vmem:[#allocation2 + $0x1c] sm:$0x1]  ;;  %v3000_v15 = vld [vmem:[%s3683_s1 + $0x160] sm:$0xff]   ;;  %vm3400_vm11 = vmor %vm981_vm9, %vm982_vm10  ;;  %p282_p4 = scmp.lt.s32.totalorder %s2245_s20, 15  ;;  %s2247_s25 = sshll.u32 %s3129_s15, 1 }
  0x18   : > { %2775 = vmatpush3.bf16.msra.mxu0 %v2984_v12  ;;  %2680 = vmatprep.subr.bf16.mxu1 %v2985_v14  ;;  %v503_v12 = vld [vmem:[#allocation2 + $0x18] sm:$0xf]  ;;  %s290_s30 = scalar_lea.vmem %s3689_s7, %s2247_s25 }
  0x19   : > { %2776 = vmatprep.subr.bf16.mxu0 %v2986_v17  ;;  %v336_v41 = vadd.f32 %v3185_v37, %v322_v31  ;;  %v337_v43 = vadd.f32 %v3185_v37, %v323_v33  ;;  %v338_v44 = vadd.f32 %v3185_v37, %v324_v39  ;;  %v339_v47 = vadd.f32 %v3185_v37, %v325_v40  ;;  %s3699_s20 = smov (!%p282_p4, %s2245_s20), 15 }
  0x1a   : > { %v585_v16 = vor.u32 %v584_v59, %v581_v58  ;;  %v2530_v40 = vunpack.c.l.bf16 %v2557_v29  ;;  %s2246_s21 = sshll.u32 %s3699_s20, 2 }
  0x1b   : > { %2681 = vmatpush3.bf16.msra.mxu1 %v2985_v14  ;;  %v344_v48 = vmax.f32 %v336_v41, 0.0  ;;  %v345_v50 = vmax.f32 %v337_v43, 0.0  ;;  %v346_v51 = vmax.f32 %v338_v44, 0.0  ;;  %v347_v53 = vmax.f32 %v339_v47, 0.0  ;;  %v509_v14 = vld [vmem:[#allocation2 + $0x20] sm:$0xf]  ;;  %s285_s26 = scalar_lea.vmem %s3688_s6, %s2246_s21 }
  0x1c   : > { %2777 = vmatpush3.bf16.msra.mxu0 %v2986_v17  ;;  %2682 = vmatprep.subr.bf16.mxu1 %v2987_v26  ;;  %v2531_v41 = vunpack.c.h.bf16 %v2557_v29  ;;  %v2558_v43 = vld [vmem:[%s3147_s29 + $0x18] sm:$0xff]   ;;  %v586_v44 = vrot.slane %v585_v16, 4  ;;  %v326_v46 = vmul.f32 %v2530_v40, %v3168_v25  ;;  %v3046_v47 = vld [vmem:[%s3683_s1 + $0x220] sm:$0xff]  }
  0x1d   : > { %2778 = vmatprep.subr.bf16.mxu0 %v2988_v28  ;;  %v2504_v54 = vpack.c.bf16 %v344_v48, %v344_v48  ;;  %v2505_v56 = vpack.c.bf16 %v345_v50, %v345_v50  ;;  %v2506_v57 = vpack.c.bf16 %v346_v51, %v346_v51  ;;  %v2507_v60 = vpack.c.bf16 %v347_v53, %v347_v53 }
  0x1e   : > { %v2534_v48 = vunpack.c.l.bf16 %v2558_v43  ;;  %v327_v50 = vmul.f32 %v2531_v41, %v3168_v25  ;;  %v2535_v51 = vunpack.c.h.bf16 %v2558_v43  ;;  %v340_v55 = vadd.f32 %v3185_v37, %v326_v46 }
  0x1f   : > { %2683 = vmatpush3.bf16.msra.mxu1 %v2987_v26  ;;  %v405_v61 = vshrl.u32 %v2504_v54, 16  ;;  %v408_v62 = vshll.u32 %v2504_v54, 16  ;;  %v413_v63 = vshrl.u32 %v2505_v56, 16  ;;  %v416_v0 = vshll.u32 %v2505_v56, 16 }
  0x20   : > { %2779 = vmatpush3.bf16.msra.mxu0 %v2988_v28  ;;  %2684 = vmatprep.subr.bf16.mxu1 %v2989_v34  ;;  %v421_v3 = vshrl.u32 %v2506_v57, 16  ;;  %v424_v4 = vshll.u32 %v2506_v57, 16  ;;  %v429_v7 = vshrl.u32 %v2507_v60, 16  ;;  %v432_v8 = vshll.u32 %v2507_v60, 16 }
  0x21   : > { %2780 = vmatprep.subr.bf16.mxu0 %v2990_v35  ;;  %v407_v9 = vrot.slane %v405_v61, 7  ;;  %v415_v11 = vrot.slane %v413_v63, 7  ;;  %v591_v56 = vsel %vm3246_vm8, %v586_v44, %v590_v45 }
  0x22   : > { %v423_v17 = vrot.slane %v421_v3, 7  ;;  %v431_v18 = vrot.slane %v429_v7, 7  ;;  %v341_v3 = vadd.f32 %v3185_v37, %v327_v50 }
  0x23   : > { %2685 = vmatpush3.bf16.msra.mxu1 %v2989_v34  ;;  %v410_v19 = vor.u32 %v408_v62, %v407_v9  ;;  %v411_v20 = vrot.slane %v407_v9, 4  ;;  %v418_v21 = vor.u32 %v416_v0, %v415_v11  ;;  %v419_v22 = vrot.slane %v415_v11, 4 }
  0x24   : > { %2781 = vmatpush3.bf16.msra.mxu0 %v2990_v35  ;;  %2694 = vmatprep.subr.bf16.mxu1 %v3202_v49  ;;  %v426_v24 = vor.u32 %v424_v4, %v423_v17  ;;  %v427_v26 = vrot.slane %v423_v17, 4  ;;  %v434_v27 = vor.u32 %v432_v8, %v431_v18  ;;  %v435_v28 = vrot.slane %v431_v18, 4 }
  0x25   : > { %2790 = vmatprep.subr.bf16.mxu0 %v3207_v52  ;;  %v489_v30 = vsel %vm3214_vm5, %v410_v19, %v488_v1  ;;  %v495_v31 = vsel %vm3220_vm6, %v411_v20, %v494_v2  ;;  %v498_v32 = vsel %vm3214_vm5, %v418_v21, %v497_v5  ;;  %v501_v33 = vsel %vm3220_vm6, %v419_v22, %v500_v6 }
  0x26   : > { %490 = vst [vmem:[#allocation2 + $0x8] sm:$0xf] %v489_v30  ;;  %496 = vst [vmem:[#allocation2 + $0xc] sm:$0x1] %v495_v31  ;;  %v504_v34 = vsel %vm3214_vm5, %v426_v24, %v503_v12  ;;  %v507_v35 = vsel %vm3220_vm6, %v427_v26, %v506_v13  ;;  %v510_v36 = vsel %vm3214_vm5, %v434_v27, %v509_v14  ;;  %v349_v46 = vmax.f32 %v341_v3, 0.0 }
  0x27   : > { %499 = vst [vmem:[#allocation2 + $0x10] sm:$0xf] %v498_v32  ;;  %502 = vst [vmem:[#allocation2 + $0x14] sm:$0x1] %v501_v33  ;;  %v513_v39 = vsel %vm3220_vm6, %v435_v28, %v512_v23  ;;  %v328_v62 = vmul.f32 %v2534_v48, %v3168_v25  ;;  %v329_v8 = vmul.f32 %v2535_v51, %v3168_v25 }
  0x28   : > { %505 = vst [vmem:[#allocation2 + $0x18] sm:$0xf] %v504_v34  ;;  %508 = vst [vmem:[#allocation2 + $0x1c] sm:$0x1] %v507_v35 }
  0x29   : > { %511 = vst [vmem:[#allocation2 + $0x20] sm:$0xf] %v510_v36  ;;  %514 = vst [vmem:[#allocation2 + $0x24] sm:$0x1] %v513_v39  ;;  %v342_v20 = vadd.f32 %v3185_v37, %v328_v62  ;;  %v343_v28 = vadd.f32 %v3185_v37, %v329_v8  ;;  %v348_v36 = vmax.f32 %v340_v55, 0.0 }
  0x2a   : > { %v515_v62 = vld [vmem:[#allocation2 + $0x28] sm:$0xf] }
  0x2b   : > { %v2508_v37 = vpack.c.bf16 %v348_v36, %v348_v36  ;;  %v350_v50 = vmax.f32 %v342_v20, 0.0  ;;  %v351_v51 = vmax.f32 %v343_v28, 0.0  ;;  %v521_v20 = vld [vmem:[#allocation2 + $0x30] sm:$0xf]  ;;  %v533_v28 = vld [vmem:[#allocation2 + $0x40] sm:$0xf] }
  0x2d   : > { %v3251_v53 = vld [vmem:[#allocation2 + $0x8] sm:$0xf]  ;;  %v3253_v54 = vld [vmem:[#allocation2 + $0xc] sm:$0x1]  ;;  %v2511_v3 = vpack.c.bf16 %v351_v51, %v351_v51  ;;  %v2999_v51 = vld [vmem:[%s3683_s1 + $0x20] sm:$0xff]  }
  0x2e   : > { %v3257_v57 = vld [vmem:[#allocation2 + $0x10] sm:$0xf]  ;;  %v593_v58 = vshrl.u32 %v3251_v53, 16  ;;  %v596_v59 = vshll.u32 %v3251_v53, 16  ;;  %v602_v60 = vshll.u32 %v3253_v54, 16 }
  0x2f   : > { %v3263_v61 = vld [vmem:[#allocation2 + $0x14] sm:$0x1]  ;;  %v3266_v63 = vld [vmem:[#allocation2 + $0x18] sm:$0xf]  ;;  %v3268_v0 = vld [vmem:[#allocation2 + $0x1c] sm:$0x1]  ;;  %v2348_v4 = vcombine.low %v3251_v53, %v3257_v57 }
  0x30   : > { %v607_v1 = vshrl.u32 %v3257_v57, 16  ;;  %v610_v2 = vshll.u32 %v3257_v57, 16  ;;  %v595_v5 = vrot.slane %v593_v58, 4  ;;  %v598_v6 = vrot.slane %v596_v59, 5  ;;  %v3279_v14 = vld [vmem:[#allocation2 + $0x20] sm:$0xf] }
  0x31   : > { %v616_v7 = vshll.u32 %v3263_v61, 16  ;;  %v621_v12 = vshrl.u32 %v3266_v63, 16  ;;  %v624_v13 = vshll.u32 %v3266_v63, 16  ;;  %v604_v17 = vrot.slane %v602_v60, 5  ;;  %v3282_v19 = vld [vmem:[#allocation2 + $0x24] sm:$0x1] }
  0x32   : > { %v609_v9 = vrot.slane %v607_v1, 4  ;;  %v612_v11 = vrot.slane %v610_v2, 5  ;;  %v599_v16 = vor.u32 %v598_v6, %v595_v5  ;;  %v630_v18 = vshll.u32 %v3268_v0, 16 }
  0x33   : > { %v618_v22 = vrot.slane %v616_v7, 5  ;;  %v623_v23 = vrot.slane %v621_v12, 4  ;;  %v626_v25 = vrot.slane %v624_v13, 5  ;;  %v635_v26 = vshrl.u32 %v3279_v14, 16  ;;  %v518_v7 = vld [vmem:[#allocation2 + $0x2c] sm:$0x1] }
  0x34   : > { %v613_v21 = vor.u32 %v612_v11, %v609_v9  ;;  %v600_v24 = vrot.slane %v599_v16, 4  ;;  %v638_v27 = vshll.u32 %v3279_v14, 16  ;;  %v632_v31 = vrot.slane %v630_v18, 5  ;;  %v2994_v9 = vld [vmem:[%s3683_s1 + $0x148] sm:$0xff]   ;;  %v2995_v16 = vld [vmem:[%s3683_s1 + $0x10] sm:$0xff]  }
  0x35   : > { %v627_v30 = vor.u32 %v626_v25, %v623_v23  ;;  %v644_v32 = vshll.u32 %v3282_v19, 16  ;;  %v637_v34 = vrot.slane %v635_v26, 4  ;;  %v437_v59 = vshrl.u32 %v2508_v37, 16  ;;  %v530_v23 = vld [vmem:[#allocation2 + $0x3c] sm:$0x1] }
  0x36   : > { %v614_v29 = vrot.slane %v613_v21, 4  ;;  %v605_v33 = vsel %vm3246_vm8, %v600_v24, %v604_v17  ;;  %v640_v35 = vrot.slane %v638_v27, 5  ;;  %v440_v60 = vshll.u32 %v2508_v37, 16  ;;  %v524_v21 = vld [vmem:[#allocation2 + $0x34] sm:$0x1] }
  0x37   : > { %v2272_v39 = vcombine.low %v591_v56, %v605_v33  ;;  %v628_v41 = vrot.slane %v627_v30, 4  ;;  %v646_v43 = vrot.slane %v644_v32, 5  ;;  %v2993_v56 = vld [vmem:[%s3683_s1 + $0x8] sm:$0xff]   ;;  %v2509_v1 = vpack.c.bf16 %v349_v46, %v349_v46  ;;  %v2996_v30 = vld [vmem:[%s3683_s1 + $0x150] sm:$0xff]  }
  0x38   : > { %v619_v40 = vsel %vm3246_vm8, %v614_v29, %v618_v22  ;;  %v641_v45 = vor.u32 %v640_v35, %v637_v34  ;;  %v2510_v2 = vpack.c.bf16 %v350_v50, %v350_v50  ;;  %v439_v6 = vrot.slane %v437_v59, 7  ;;  %v536_v29 = vld [vmem:[#allocation2 + $0x44] sm:$0x1]  ;;  %v2998_v50 = vld [vmem:[%s3683_s1 + $0x158] sm:$0xff]   ;;  %v3001_v59 = vld [vmem:[%s3683_s1 + $0x28] sm:$0xff]  }
  0x39   : > { %v2376_v44 = vcombine.low %v605_v33, %v619_v40  ;;  %2686 = vmatprep.mubr.bf16.mxu1 %v2272_v39  ;;  %v633_v48 = vsel %vm3246_vm8, %v628_v41, %v632_v31  ;;  %v445_v11 = vshrl.u32 %v2509_v1, 16  ;;  %v448_v12 = vshll.u32 %v2509_v1, 16 }
  0x3a   : > { %v3295_v58 = vcombine.low %v619_v40, %v633_v48  ;;  %v642_v55 = vrot.slane %v641_v45, 4  ;;  %v453_v13 = vshrl.u32 %v2510_v2, 16  ;;  %v442_v17 = vor.u32 %v440_v60, %v439_v6 }
  0x3b   : > { %2782 = vmatprep.mubr.bf16.mxu0 %v2376_v44  ;;  %v443_v18 = vrot.slane %v439_v6, 4  ;;  %v456_v22 = vshll.u32 %v2510_v2, 16  ;;  %v461_v25 = vshrl.u32 %v2511_v3, 16  ;;  %v447_v24 = vrot.slane %v445_v11, 7 }
  0x3c   : > { %2687 = vmatmul.mubr.bf16.vlgmr.msra.gmra.mrb[0].mxu1 %v3295_v58  ;;  %v3303_v5 = vsel %vm3246_vm8, %v642_v55, %v646_v43  ;;  %v455_v26 = vrot.slane %v453_v13, 7  ;;  %v464_v27 = vshll.u32 %v2511_v3, 16  ;;  %v516_v31 = vsel %vm3214_vm5, %v442_v17, %v515_v62 }
  0x3d   : > { %2695 = vmatpush3.bf16.msra.mxu1 %v3202_v49  ;;  %v2377_v8 = vcombine.low %v633_v48, %v3303_v5  ;;  %v527_v49 = vld [vmem:[#allocation2 + $0x38] sm:$0xf]  ;;  %v519_v32 = vsel %vm3220_vm6, %v443_v18, %v518_v7  ;;  %v463_v33 = vrot.slane %v461_v25, 7  ;;  %517 = vst [vmem:[#allocation2 + $0x28] sm:$0xf] %v516_v31  ;;  %v450_v34 = vor.u32 %v448_v12, %v447_v24 }
  0x3e   : > { %2696 = vmatprep.subr.bf16.mxu1 %v2993_v56  ;;  %520 = vst [vmem:[#allocation2 + $0x2c] sm:$0x1] %v519_v32  ;;  %v451_v35 = vrot.slane %v447_v24, 4  ;;  %v458_v36 = vor.u32 %v456_v22, %v455_v26  ;;  %v459_v39 = vrot.slane %v455_v26, 4  ;;  %v2349_v10 = vcombine.low %v3266_v63, %v3279_v14  ;;  %v3368_v18 = vld [vmem:[#allocation2 + $0x48] sm:$0xf] }
  0x3f   : > { %2783 = vmatmul.mubr.bf16.vlgmr.msra.gmra.mrb[0].mxu0 %v2377_v8  ;;  %v466_v40 = vor.u32 %v464_v27, %v463_v33  ;;  %v467_v41 = vrot.slane %v463_v33, 4  ;;  %v522_v43 = vsel %vm3214_vm5, %v450_v34, %v521_v20  ;;  %v990_v55 = vrot.slane %v3253_v54, 5  ;;  %v3003_v26 = vld [vmem:[%s3683_s1 + $0x30] sm:$0xff]  }
  0x40   : > { %2791 = vmatpush3.bf16.msra.mxu0 %v3207_v52  ;;  %v2997_v52 = vld [vmem:[%s3683_s1 + $0x18] sm:$0xff]   ;;  %v525_v44 = vsel %vm3220_vm6, %v451_v35, %v524_v21  ;;  %v528_v45 = vsel %vm3214_vm5, %v458_v36, %v527_v49  ;;  %v531_v37 = vsel %vm3220_vm6, %v459_v39, %v530_v23  ;;  %523 = vst [vmem:[#allocation2 + $0x30] sm:$0xf] %v522_v43  ;;  %v998_v1 = vrot.slane %v3268_v0, 5  ;;  %v3376_v23 = vld [vmem:[#allocation2 + $0x4c] sm:$0x1] }
  0x41   : > { %2792 = vmatprep.subr.bf16.mxu0 %v2994_v9  ;;  %2697 = vmatpush3.bf16.msra.mxu1 %v2993_v56  ;;  %526 = vst [vmem:[#allocation2 + $0x34] sm:$0x1] %v525_v44  ;;  %529 = vst [vmem:[#allocation2 + $0x38] sm:$0xf] %v528_v45  ;;  %v534_v46 = vsel %vm3214_vm5, %v466_v40, %v533_v28  ;;  %v537_v48 = vsel %vm3220_vm6, %v467_v41, %v536_v29  ;;  %v994_v56 = vrot.slane %v3263_v61, 5  ;;  %v3004_v45 = vld [vmem:[%s3683_s1 + $0x170] sm:$0xff]  }
  0x42   : > { %2698 = vmatprep.subr.bf16.mxu1 %v2995_v16  ;;  %532 = vst [vmem:[#allocation2 + $0x3c] sm:$0x1] %v531_v37  ;;  %535 = vst [vmem:[#allocation2 + $0x40] sm:$0xf] %v534_v46  ;;  %v1002_v7 = vrot.slane %v3282_v19, 5  ;;  %v2297_v8 = vrot.slane %v3251_v53, 9 }
  0x43   : > { %538 = vst [vmem:[#allocation2 + $0x44] sm:$0x1] %v537_v48  ;;  %v2298_v17 = vrot.slane %v3257_v57, 9  ;;  %v2467_v35 = vrot.slane %v3368_v18, 9  ;;  %v1931_v41 = vrot.slane %v3376_v23, 5  ;;  %v3008_v61 = vld [vmem:[%s3683_s1 + $0x80] sm:$0xff]  }
  0x44   : > { %2793 = vmatpush3.bf16.msra.mxu0 %v2994_v9  ;;  %v3352_v60 = vld [vmem:[#allocation2 + $0x28] sm:$0xf]  ;;  %v3016_v48 = vld [vmem:[%s3683_s1 + $0x198] sm:$0xff]  }
  0x45   : > { %2794 = vmatprep.subr.bf16.mxu0 %v2996_v30  ;;  %2699 = vmatpush3.bf16.msra.mxu1 %v2995_v16  ;;  %v3354_v62 = vld [vmem:[#allocation2 + $0x2c] sm:$0x1]  ;;  %v649_v2 = vshrl.u32 %v3352_v60, 16  ;;  %v652_v3 = vshll.u32 %v3352_v60, 16  ;;  %v3431_v54 = vsel %vm3400_vm11, %v2298_v17, %v994_v56  ;;  %v3444_v17 = vsel %vm3400_vm11, %v2467_v35, %v1931_v41 }
  0x46   : > { %2700 = vmatprep.subr.bf16.mxu1 %v2997_v52  ;;  %v658_v6 = vshll.u32 %v3354_v62, 16  ;;  %v3002_v9 = vld [vmem:[%s3683_s1 + $0x168] sm:$0xff]   ;;  %v2301_v35 = vrot.slane %v3352_v60, 9 }
  0x47   : > { %v651_v11 = vrot.slane %v649_v2, 4  ;;  %v654_v12 = vrot.slane %v652_v3, 5  ;;  %v3365_v16 = vld [vmem:[#allocation2 + $0x30] sm:$0xf] }
  0x48   : > { %2795 = vmatpush3.bf16.msra.mxu0 %v2996_v30  ;;  %v660_v13 = vrot.slane %v658_v6, 5  ;;  %v3370_v20 = vld [vmem:[#allocation2 + $0x34] sm:$0x1]  ;;  %v663_v21 = vshrl.u32 %v3365_v16, 16  ;;  %v666_v22 = vshll.u32 %v3365_v16, 16  ;;  %v2350_v25 = vcombine.low %v3352_v60, %v3365_v16 }
  0x49   : > { %2796 = vmatprep.subr.bf16.mxu0 %v2998_v50  ;;  %2701 = vmatpush3.bf16.msra.mxu1 %v2997_v52  ;;  %v3374_v49 = vld [vmem:[#allocation2 + $0x38] sm:$0xf]  ;;  %v655_v24 = vor.u32 %v654_v12, %v651_v11  ;;  %v672_v27 = vshll.u32 %v3370_v20, 16  ;;  %v3384_v28 = vld [vmem:[#allocation2 + $0x3c] sm:$0x1] }
  0x4a   : > { %2702 = vmatprep.subr.bf16.mxu1 %v2999_v51  ;;  %v677_v29 = vshrl.u32 %v3374_v49, 16  ;;  %v680_v30 = vshll.u32 %v3374_v49, 16  ;;  %v665_v31 = vrot.slane %v663_v21, 4  ;;  %v668_v32 = vrot.slane %v666_v22, 5  ;;  %v3389_v34 = vld [vmem:[#allocation2 + $0x40] sm:$0xf] }
  0x4b   : > { %v686_v33 = vshll.u32 %v3384_v28, 16  ;;  %v656_v36 = vrot.slane %v655_v24, 4  ;;  %v556_v40 = vld [vmem:[#allocation2 + $0x44] sm:$0x1]  ;;  %v674_v44 = vrot.slane %v672_v27, 5  ;;  %v1319_v37 = vshrl.u32 %v3389_v34, 16 }
  0x4c   : > { %2797 = vmatpush3.bf16.msra.mxu0 %v2998_v50  ;;  %v679_v39 = vrot.slane %v677_v29, 4  ;;  %v682_v52 = vrot.slane %v680_v30, 5  ;;  %v669_v43 = vor.u32 %v668_v32, %v665_v31  ;;  %v1322_v46 = vshll.u32 %v3389_v34, 16  ;;  %v3005_v21 = vld [vmem:[%s3683_s1 + $0x38] sm:$0xff]  }
  0x4d   : > { %2798 = vmatprep.subr.bf16.mxu0 %v3000_v15  ;;  %2703 = vmatpush3.bf16.msra.mxu1 %v2999_v51  ;;  %v661_v50 = vsel %vm3246_vm8, %v656_v36, %v660_v13  ;;  %v1328_v2 = vshll.u32 %v556_v40, 16  ;;  %v1321_v11 = vrot.slane %v1319_v37, 4  ;;  %v3418_v13 = vsel %vm3400_vm11, %v2297_v8, %v990_v55  ;;  %v3006_v30 = vld [vmem:[%s3683_s1 + $0x178] sm:$0xff]   ;;  %v3009_v36 = vld [vmem:[%s3683_s1 + $0x180] sm:$0xff]  }
  0x4e   : > { %2704 = vmatprep.subr.bf16.mxu1 %v3001_v59  ;;  %v683_v51 = vor.u32 %v682_v52, %v679_v39  ;;  %v3407_v3 = vcombine.low %v3303_v5, %v661_v50  ;;  %v670_v6 = vrot.slane %v669_v43, 4  ;;  %v1324_v12 = vrot.slane %v1322_v46, 5 }
  0x4f   : > { %v2299_v5 = vrot.slane %v3266_v63, 9  ;;  %v1330_v29 = vrot.slane %v1328_v2, 5  ;;  %v2388_v31 = vrot.slane %v3389_v34, 9  ;;  %v1482_v56 = vrot.slane %v556_v40, 5 }
  0x50   : > { %2799 = vmatpush3.bf16.msra.mxu0 %v3000_v15  ;;  %v688_v15 = vrot.slane %v686_v33, 5  ;;  %v684_v22 = vrot.slane %v683_v51, 4  ;;  %2690 = vmatprep.mubr.bf16.mxu1 %v3407_v3  ;;  %v675_v24 = vsel %vm3246_vm8, %v670_v6, %v674_v44  ;;  %v1325_v27 = vor.u32 %v1324_v12, %v1321_v11  ;;  %v3012_v12 = vld [vmem:[%s3683_s1 + $0x188] sm:$0xff]  }
  0x51   : > { %2800 = vmatprep.subr.bf16.mxu0 %v3002_v9  ;;  %2705 = vmatpush3.bf16.msra.mxu1 %v3001_v59  ;;  %v2284_v59 = vcombine.low %v3187_v38, %v3251_v53  ;;  %v2378_v55 = vcombine.low %v661_v50, %v675_v24  ;;  %v2351_v39 = vcombine.low %v3374_v49, %v3389_v34  ;;  %v1006_v40 = vrot.slane %v3354_v62, 5  ;;  %v3036_v53 = vld [vmem:[%s3683_s1 + $0x1e8] sm:$0xff]  }
  0x52   : > { %2706 = vmatprep.subr.bf16.mxu1 %v3003_v26  ;;  %v689_v8 = vsel %vm3246_vm8, %v684_v22, %v688_v15  ;;  %v1326_v33 = vrot.slane %v1325_v27, 4  ;;  %v3462_v41 = vsel %vm3400_vm11, %v2388_v31, %v1482_v56  ;;  %v2302_v44 = vrot.slane %v3365_v16, 9  ;;  %v3014_v22 = vld [vmem:[%s3683_s1 + $0x190] sm:$0xff]   ;;  %v3017_v27 = vld [vmem:[%s3683_s1 + $0xa0] sm:$0xff]   ;;  %v3024_v31 = vld [vmem:[%s3683_s1 + $0x1b8] sm:$0xff]  }
  0x53   : > { %v3437_v32 = vcombine.low %v675_v24, %v689_v8  ;;  %2786 = vmatprep.mubr.bf16.mxu0 %v2378_v55  ;;  %v1010_v37 = vrot.slane %v3370_v20, 5  ;;  %v2484_v46 = vcombine.low %v3462_v41, %v3444_v17  ;;  %v3473_v62 = vsel %vm3400_vm11, %v2299_v5, %v998_v1  ;;  %v3011_v1 = vld [vmem:[%s3683_s1 + $0x88] sm:$0xff]   ;;  %v3021_v55 = vld [vmem:[%s3683_s1 + $0xb0] sm:$0xff]   ;;  %v3026_v56 = vld [vmem:[%s3683_s1 + $0x1c0] sm:$0xff]  }
  0x54   : > { %2801 = vmatpush3.bf16.msra.mxu0 %v3002_v9  ;;  %v2300_v9 = vrot.slane %v3279_v14, 9  ;;  %v3456_v52 = vsel %vm3246_vm8, %v1326_v33, %v1330_v29  ;;  %v2285_v20 = vcombine.low %v3257_v57, %v3266_v63  ;;  %v3485_v50 = vcombine.low %v3279_v14, %v3352_v60  ;;  %v3019_v29 = vld [vmem:[%s3683_s1 + $0xa8] sm:$0xff]   ;;  %v3025_v33 = vld [vmem:[%s3683_s1 + $0xc0] sm:$0xff]   ;;  %v3037_v57 = vld [vmem:[%s3683_s1 + $0xf0] sm:$0xff]  }
  0x55   : > { %2802 = vmatprep.subr.bf16.mxu0 %v3004_v45  ;;  %2707 = vmatpush3.bf16.msra.mxu1 %v3003_v26  ;;  %v2405_v26 = vcombine.low %v3418_v13, %v3431_v54  ;;  %v2379_v43 = vcombine.low %v689_v8, %v3456_v52  ;;  %v3489_v0 = vsel %vm3400_vm11, %v2301_v35, %v1006_v40  ;;  %v2296_v15 = vrot.slane %v3187_v38, 9  ;;  %v3013_v38 = vld [vmem:[%s3683_s1 + $0x90] sm:$0xff]   ;;  %v3045_v14 = vld [vmem:[%s3683_s1 + $0x218] sm:$0xff]   ;;  %v3047_v60 = vld [vmem:[%s3683_s1 + $0x228] sm:$0xff]  }
  0x56   : > { %2708 = vmatprep.subr.bf16.mxu1 %v3005_v21  ;;  %2691 = vmatmul.mubr.bf16.gmra.mrb[4].mxu1 %v3437_v32  ;;  %v3493_v19 = vsel %vm3400_vm11, %v2302_v44, %v1010_v37  ;;  %v2303_v6 = vrot.slane %v3374_v49, 9  ;;  %v1014_v11 = vrot.slane %v3384_v28, 5  ;;  %v2287_v28 = vcombine.low %v3365_v16, %v3374_v49  ;;  %v3022_v8 = vld [vmem:[%s3683_s1 + $0x1b0] sm:$0xff]   ;;  %v3031_v44 = vld [vmem:[%s3683_s1 + $0xd8] sm:$0xff]  }
  0x57   : > { %2710 = vmatprep.mubr.bf16.mxu1 %v2284_v59  ;;  %2787 = vmatmul.mubr.bf16.gmra.mrb[4].mxu0 %v2379_v43  ;;  %v2407_v2 = vcombine.low %v3489_v0, %v3493_v19  ;;  %v3015_v59 = vld [vmem:[%s3683_s1 + $0x98] sm:$0xff]   ;;  %v3029_v35 = vld [vmem:[%s3683_s1 + $0xd0] sm:$0xff]   ;;  %v2433_v37 = vcombine.low %v3389_v34, %v3368_v18 }
  0x58   : > { %2803 = vmatpush3.bf16.msra.mxu0 %v3004_v45  ;;  %v3479_v45 = vsel %vm3400_vm11, %v2300_v9, %v1002_v7  ;;  %2806 = vmatprep.mubr.bf16.mxu0 %v2405_v26  ;;  %v986_v7 = vrot.slane %v3192_v42, 5  ;;  %v3023_v9 = vld [vmem:[%s3683_s1 + $0xb8] sm:$0xff]   ;;  %v3027_v26 = vld [vmem:[%s3683_s1 + $0xc8] sm:$0xff]   ;;  %v3030_v43 = vld [vmem:[%s3683_s1 + $0x1d0] sm:$0xff]  }
  0x59   : > { %2804 = vmatprep.subr.bf16.mxu0 %v3006_v30  ;;  %2709 = vmatpush3.bf16.msra.mxu1 %v3005_v21  ;;  %v2406_v51 = vcombine.low %v3473_v62, %v3479_v45  ;;  %v1015_v21 = vsel %vm3400_vm11, %v2303_v6, %v1014_v11  ;;  %v3043_v6 = vld [vmem:[%s3683_s1 + $0x208] sm:$0xff]   ;;  %v3048_v16 = vld [vmem:[%s3683_s1 + $0x230] sm:$0xff]   ;;  %v3049_v49 = vld [vmem:[%s3683_s1 + $0x238] sm:$0xff]  }
  0x5a   : > { %2718 = vmatprep.subr.bf16.mxu1 %v3008_v61  ;;  %v987_v42 = vsel %vm3400_vm11, %v2296_v15, %v986_v7  ;;  %v2408_v24 = vcombine.low %v1015_v21, %v3462_v41  ;;  %v3581_v40 = vcombine.low %v3493_v19, %v1015_v21  ;;  %v3040_v19 = vld [vmem:[%s3683_s1 + $0xf8] sm:$0xff]  }
  0x5b   : > { %v2320_v5 = vcombine.low %v987_v42, %v3418_v13  ;;  %v3018_v13 = vld [vmem:[%s3683_s1 + $0x1a0] sm:$0xff]  }
  0x5c   : > { %2805 = vmatpush3.bf16.msra.mxu0 %v3006_v30  ;;  %v3020_v30 = vld [vmem:[%s3683_s1 + $0x1a8] sm:$0xff]  }
  0x5d   : > { %2814 = vmatprep.subr.bf16.mxu0 %v3009_v36 }
  0x5e   : > { %2711 = vmatmul.mubr.bf16.vlgmr.msra.gmra.mrb[0].mxu1 %v2285_v20 }
  0x5f   : > { %2719 = vmatpush3.bf16.msra.mxu1 %v3008_v61  ;;  %2714 = vmatprep.mubr.bf16.mxu1 %v3485_v50  ;;  %v3559_v61 = vcombine.low %v3431_v54, %v3473_v62  ;;  %v3028_v54 = vld [vmem:[%s3683_s1 + $0x1c8] sm:$0xff]   ;;  %v3032_v62 = vld [vmem:[%s3683_s1 + $0x1d8] sm:$0xff]  }
  0x60   : > { %2720 = vmatprep.subr.bf16.mxu1 %v3011_v1  ;;  %2807 = vmatmul.mubr.bf16.vlgmr.msra.gmra.mrb[0].mxu0 %v2406_v51  ;;  %v3042_v51 = vld [vmem:[%s3683_s1 + $0x200] sm:$0xff]  }
  0x61   : > { %2815 = vmatpush3.bf16.msra.mxu0 %v3009_v36  ;;  %2810 = vmatprep.mubr.bf16.mxu0 %v2407_v2  ;;  %v3569_v36 = vcombine.low %v3479_v45, %v3489_v0  ;;  %v3033_v45 = vld [vmem:[%s3683_s1 + $0xe0] sm:$0xff]   ;;  %v3039_v0 = vld [vmem:[%s3683_s1 + $0x1f0] sm:$0xff]   ;;  %v1783_v2 = vshll.u32 %v3376_v23, 16 }
  0x62   : > { %2816 = vmatprep.subr.bf16.mxu0 %v3012_v12  ;;  %v3044_v23 = vld [vmem:[%s3683_s1 + $0x210] sm:$0xff]  }
  0x63   : > { %2721 = vmatpush3.bf16.msra.mxu1 %v3011_v1 }
  0x64   : > { %2722 = vmatprep.subr.bf16.mxu1 %v3013_v38 }
  0x65   : > { %2817 = vmatpush3.bf16.msra.mxu0 %v3012_v12  ;;  %v1785_v12 = vrot.slane %v1783_v2, 5 }
  0x66   : > { %2715 = vmatmul.mubr.bf16.gmra.mrb[4].mxu1 %v2287_v28  ;;  %2818 = vmatprep.subr.bf16.mxu0 %v3014_v22 }
  0x67   : > { %2723 = vmatpush3.bf16.msra.mxu1 %v3013_v38  ;;  %2734 = vmatprep.mubr.bf16.mxu1 %v2320_v5 }
  0x68   : > { %2724 = vmatprep.subr.bf16.mxu1 %v3015_v59  ;;  %2811 = vmatmul.mubr.bf16.gmra.mrb[4].mxu0 %v2408_v24 }
  0x69   : > { %2819 = vmatpush3.bf16.msra.mxu0 %v3014_v22  ;;  %2830 = vmatprep.mubr.bf16.mxu0 %v2285_v20  ;;  %v3034_v20 = vld [vmem:[%s3683_s1 + $0x1e0] sm:$0xff]  }
  0x6a   : > { %2820 = vmatprep.subr.bf16.mxu0 %v3016_v48 }
  0x6b   : > { %2725 = vmatpush3.bf16.msra.mxu1 %v3015_v59 }
  0x6c   : > { %2726 = vmatprep.subr.bf16.mxu1 %v3017_v27 }
  0x6d   : > { %2821 = vmatpush3.bf16.msra.mxu0 %v3016_v48 }
  0x6e   : > { %2822 = vmatprep.subr.bf16.mxu0 %v3018_v13 }
  0x6f   : > { %2727 = vmatpush3.bf16.msra.mxu1 %v3017_v27 }
  0x70   : > { %2728 = vmatprep.subr.bf16.mxu1 %v3019_v29 }
  0x71   : > { %2823 = vmatpush3.bf16.msra.mxu0 %v3018_v13 }
  0x72   : > { %2824 = vmatprep.subr.bf16.mxu0 %v3020_v30 }
  0x73   : > { %2729 = vmatpush3.bf16.msra.mxu1 %v3019_v29 }
  0x74   : > { %2730 = vmatprep.subr.bf16.mxu1 %v3021_v55 }
  0x75   : > { %2825 = vmatpush3.bf16.msra.mxu0 %v3020_v30 }
  0x76   : > { %2826 = vmatprep.subr.bf16.mxu0 %v3022_v8 }
  0x77   : > { %2731 = vmatpush3.bf16.msra.mxu1 %v3021_v55 }
  0x78   : > { %2732 = vmatprep.subr.bf16.mxu1 %v3023_v9 }
  0x79   : > { %2827 = vmatpush3.bf16.msra.mxu0 %v3022_v8 }
  0x7a   : > { %2828 = vmatprep.subr.bf16.mxu0 %v3024_v31 }
  0x7b   : > { %2733 = vmatpush3.bf16.msra.mxu1 %v3023_v9 }
  0x7c   : > { %2742 = vmatprep.subr.bf16.mxu1 %v3025_v33 }
  0x7d   : > { %2829 = vmatpush3.bf16.msra.mxu0 %v3024_v31 }
  0x7e   : > { %2735 = vmatmul.mubr.bf16.vlgmr.msra.gmra.mrb[0].mxu1 %v3559_v61  ;;  %2838 = vmatprep.subr.bf16.mxu0 %v3026_v56 }
  0x7f   : > { %2743 = vmatpush3.bf16.msra.mxu1 %v3025_v33  ;;  %2738 = vmatprep.mubr.bf16.mxu1 %v3569_v36 }
  0x80   : > { %2744 = vmatprep.subr.bf16.mxu1 %v3027_v26  ;;  %2831 = vmatmul.mubr.bf16.vlgmr.msra.gmra.mrb[0].mxu0 %v3485_v50  ;;  %v3035_v50 = vld [vmem:[%s3683_s1 + $0xe8] sm:$0xff]  }
  0x81   : > { %2839 = vmatpush3.bf16.msra.mxu0 %v3026_v56  ;;  %2834 = vmatprep.mubr.bf16.mxu0 %v2287_v28 }
  0x82   : > { %2840 = vmatprep.subr.bf16.mxu0 %v3028_v54 }
  0x83   : > { %2745 = vmatpush3.bf16.msra.mxu1 %v3027_v26 }
  0x84   : > { %2746 = vmatprep.subr.bf16.mxu1 %v3029_v35 }
  0x85   : > { %2841 = vmatpush3.bf16.msra.mxu0 %v3028_v54 }
  0x86   : > { %2739 = vmatmul.mubr.bf16.gmra.mrb[4].mxu1 %v3581_v40  ;;  %2842 = vmatprep.subr.bf16.mxu0 %v3030_v43 }
  0x87   : > { %2747 = vmatpush3.bf16.msra.mxu1 %v3029_v35  ;;  %2758 = vmatprep.mubr.bf16.mxu1 %v2348_v4  ;;  %v1774_v4 = vshrl.u32 %v3368_v18, 16 }
  0x88   : > { %2748 = vmatprep.subr.bf16.mxu1 %v3031_v44  ;;  %2835 = vmatmul.mubr.bf16.gmra.mrb[4].mxu0 %v2433_v37 }
  0x89   : > { %2843 = vmatpush3.bf16.msra.mxu0 %v3030_v43  ;;  %2854 = vmatprep.mubr.bf16.mxu0 %v3295_v58  ;;  %v1777_v58 = vshll.u32 %v3368_v18, 16  ;;  %v1776_v1 = vrot.slane %v1774_v4, 4  ;;  %v3041_v18 = vld [vmem:[%s3683_s1 + $0x1f8] sm:$0xff]  }
  0x8a   : > { %2844 = vmatprep.subr.bf16.mxu0 %v3032_v62 }
  0x8b   : > { %2749 = vmatpush3.bf16.msra.mxu1 %v3031_v44  ;;  %v1779_v7 = vrot.slane %v1777_v58, 5 }
  0x8c   : > { %2750 = vmatprep.subr.bf16.mxu1 %v3033_v45 }
  0x8d   : > { %2845 = vmatpush3.bf16.msra.mxu0 %v3032_v62  ;;  %v1780_v15 = vor.u32 %v1779_v7, %v1776_v1 }
  0x8e   : > { %2846 = vmatprep.subr.bf16.mxu0 %v3034_v20 }
  0x8f   : > { %2751 = vmatpush3.bf16.msra.mxu1 %v3033_v45  ;;  %v1781_v11 = vrot.slane %v1780_v15, 4 }
  0x90   : > { %2752 = vmatprep.subr.bf16.mxu1 %v3035_v50 }
  0x91   : > { %2847 = vmatpush3.bf16.msra.mxu0 %v3034_v20  ;;  %v1786_v63 = vsel %vm3246_vm8, %v1781_v11, %v1785_v12 }
  0x92   : > { %2848 = vmatprep.subr.bf16.mxu0 %v3036_v53 }
  0x93   : > { %2753 = vmatpush3.bf16.msra.mxu1 %v3035_v50 }
  0x94   : > { %2754 = vmatprep.subr.bf16.mxu1 %v3037_v57 }
  0x95   : > { %2849 = vmatpush3.bf16.msra.mxu0 %v3036_v53 }
  0x96   : > { %2850 = vmatprep.subr.bf16.mxu0 %v3039_v0 }
  0x97   : > { %2755 = vmatpush3.bf16.msra.mxu1 %v3037_v57 }
  0x98   : > { %2756 = vmatprep.subr.bf16.mxu1 %v3040_v19 }
  0x99   : > { %2851 = vmatpush3.bf16.msra.mxu0 %v3039_v0 }
  0x9a   : > { %2852 = vmatprep.subr.bf16.mxu0 %v3041_v18 }
  0x9b   : > { %2757 = vmatpush3.bf16.msra.mxu1 %v3040_v19 }
  0x9c   : > { %2886 = vmatprep.subr.bf16.mxu1 %v3042_v51 }
  0x9d   : > { %2853 = vmatpush3.bf16.msra.mxu0 %v3041_v18 }
  0x9e   : > { %2759 = vmatmul.mubr.bf16.vlgmr.msra.gmra.mrb[0].mxu1 %v2349_v10  ;;  %2862 = vmatprep.subr.bf16.mxu0 %v3042_v51  ;;  %v2458_v10 = vcombine.low %v3456_v52, %v1786_v63 }
  0x9f   : > { %2894 = vmatpush3.bf16.msra.mxu1 %v3042_v51  ;;  %2762 = vmatprep.mubr.bf16.mxu1 %v2350_v25 }
  0xa0   : > { %2887 = vmatprep.subr.bf16.mxu1 %v3043_v6  ;;  %2855 = vmatmul.mubr.bf16.vlgmr.msra.gmra.mrb[0].mxu0 %v3407_v3 }
  0xa1   : > { %2863 = vmatpush3.bf16.msra.mxu0 %v3042_v51  ;;  %2858 = vmatprep.mubr.bf16.mxu0 %v3437_v32 }
  0xa2   : > { %2864 = vmatprep.subr.bf16.mxu0 %v3043_v6 }
  0xa3   : > { %2895 = vmatpush3.bf16.msra.mxu1 %v3043_v6 }
  0xa4   : > { %2888 = vmatprep.subr.bf16.mxu1 %v3044_v23 }
  0xa5   : > { %2865 = vmatpush3.bf16.msra.mxu0 %v3043_v6 }
  0xa6   : > { %2763 = vmatmul.mubr.bf16.gmra.mrb[4].mxu1 %v2351_v39  ;;  %2866 = vmatprep.subr.bf16.mxu0 %v3044_v23 }
  0xa7   : > { %2896 = vmatpush3.bf16.msra.mxu1 %v3044_v23  ;;  %2882 = vmatprep.mubr.bf16.mxu1 %v3581_v40 }
  0xa8   : > { %2889 = vmatprep.subr.bf16.mxu1 %v3045_v14  ;;  %2859 = vmatmul.mubr.bf16.gmra.mrb[4].mxu0 %v2458_v10 }
  0xa9   : > { %2867 = vmatpush3.bf16.msra.mxu0 %v3044_v23  ;;  %2878 = vmatprep.mubr.bf16.mxu0 %v3559_v61 }
  0xaa   : > { %2868 = vmatprep.subr.bf16.mxu0 %v3045_v14 }
  0xab   : > { %2897 = vmatpush3.bf16.msra.mxu1 %v3045_v14 }
  0xac   : > { %2890 = vmatprep.subr.bf16.mxu1 %v3046_v47 }
  0xad   : > { %2869 = vmatpush3.bf16.msra.mxu0 %v3045_v14 }
  0xae   : > { %2870 = vmatprep.subr.bf16.mxu0 %v3046_v47 }
  0xaf   : > { %2898 = vmatpush3.bf16.msra.mxu1 %v3046_v47 }
  0xb0   : > { %2891 = vmatprep.subr.bf16.mxu1 %v3047_v60 }
  0xb1   : > { %2871 = vmatpush3.bf16.msra.mxu0 %v3046_v47 }
  0xb2   : > { %2872 = vmatprep.subr.bf16.mxu0 %v3047_v60 }
  0xb3   : > { %2899 = vmatpush3.bf16.msra.mxu1 %v3047_v60 }
  0xb4   : > { %2892 = vmatprep.subr.bf16.mxu1 %v3048_v16 }
  0xb5   : > { %2873 = vmatpush3.bf16.msra.mxu0 %v3047_v60 }
  0xb6   : > { %2874 = vmatprep.subr.bf16.mxu0 %v3048_v16 }
  0xb7   : > { %2900 = vmatpush3.bf16.msra.mxu1 %v3048_v16 }
  0xb8   : > { %2893 = vmatprep.subr.bf16.mxu1 %v3049_v49 }
  0xb9   : > { %2875 = vmatpush3.bf16.msra.mxu0 %v3048_v16 }
  0xba   : > { %2876 = vmatprep.subr.bf16.mxu0 %v3049_v49 }
  0xbb   : > { %2901 = vmatpush3.bf16.msra.mxu1 %v3049_v49 }
  0xbd   : > { %2877 = vmatpush3.bf16.msra.mxu0 %v3049_v49 }
  0xbe   : > { %2883 = vmatmul.mubr.bf16.vlgmr.msra.gmra.mrb[8].mxu1 %v2484_v46 }
  0xc0   : > { %2879 = vmatmul.mubr.bf16.vlgmr.msra.gmra.mrb[0].mxu0 %v3569_v36 }
 0x171   : > { %v2760_v25 = vpop.f32.mrb[0].mxu1 }
 0x172   : > { %v1279_v34 = vpop.f32.mrb[1].mxu1 }
 0x173   : > { %v2761_v3 = vpop.f32.mrb[2].mxu1 }
 0x174   : > { %v1282_v32 = vpop.f32.mrb[3].mxu1 }
 0x179   : > { %v2764_v39 = vpop.f32.mrb[4].mxu1 }
 0x17a   : > { %v1295_v52 = vpop.f32.mrb[5].mxu1 }
 0x17b   : > { %v2765_v38 = vpop.f32.mrb[6].mxu1  ;;  %v2860_v42 = vpop.f32.mrb[4].mxu0 }
 0x17c   : > { %v1298_v28 = vpop.f32.mrb[7].mxu1  ;;  %v2906_v21 = vadd.f32 %v2860_v42, %v2764_v39  ;;  %v1905_v22 = vpop.f32.mrb[5].mxu0 }
 0x17d   : > { %v2908_v59 = vadd.f32 %v1905_v22, %v1295_v52  ;;  %v2861_v5 = vpop.f32.mrb[6].mxu0 }
 0x17e   : > { %v2910_v24 = vadd.f32 %v2861_v5, %v2765_v38  ;;  %v1908_v48 = vpop.f32.mrb[7].mxu0 }
 0x17f   : > { %v2912_v17 = vadd.f32 %v1908_v48, %v1298_v28 }
 0x191   : > { %v2884_v41 = vpop.f32.mrb[8].mxu1 }
 0x192   : > { %v2907_v46 = vadd.f32 %v2906_v21, %v2884_v41  ;;  %v2051_v27 = vpop.f32.mrb[9].mxu1 }
 0x193   : > { %v2909_v13 = vadd.f32 %v2908_v59, %v2051_v27  ;;  %v2885_v29 = vpop.f32.mrb[10].mxu1  ;;  %v2880_v30 = vpop.f32.mrb[0].mxu0 }
 0x194   : > { %v2911_v55 = vadd.f32 %v2910_v24, %v2885_v29  ;;  %v2054_v8 = vpop.f32.mrb[11].mxu1  ;;  %v2902_v9 = vadd.f32 %v2880_v30, %v2760_v25  ;;  %v2035_v31 = vpop.f32.mrb[1].mxu0  ;;  %v2133_v15 = vmul.f32 %v2907_v46, %v2907_v46 }
 0x195   : > { %v2913_v33 = vadd.f32 %v2912_v17, %v2054_v8  ;;  %v2903_v61 = vadd.f32 %v2035_v31, %v1279_v34  ;;  %v2881_v56 = vpop.f32.mrb[2].mxu0  ;;  %v2131_v0 = vmul.f32 %v2909_v13, %v2909_v13 }
 0x196   : > { %v2554_v26 = vpack.c.bf16 %v2911_v55, %v2907_v46  ;;  %v2904_v36 = vadd.f32 %v2881_v56, %v2761_v3  ;;  %v2038_v54 = vpop.f32.mrb[3].mxu0  ;;  %v2129_v20 = vmul.f32 %v2902_v9, %v2902_v9  ;;  %v2134_v11 = vmul.f32 %v2911_v55, %v2911_v55 }
 0x197   : > { %v2549_v35 = vpack.c.bf16 %v2913_v33, %v2909_v13  ;;  %v2905_v40 = vadd.f32 %v2038_v54, %v1282_v32  ;;  %v2127_v44 = vmul.f32 %v2903_v61, %v2903_v61  ;;  %v2132_v18 = vmul.f32 %v2913_v33, %v2913_v33 }
 0x198   : > { %2561 = vst [vmem:[%s285_s26 + $0x18] sm:$0xff] %v2554_v26   ;;  %v2544_v43 = vpack.c.bf16 %v2904_v36, %v2902_v9  ;;  %v2130_v57 = vmul.f32 %v2904_v36, %v2904_v36 }
 0x199   : > { %2560 = vst [vmem:[%s285_s26 + $0x10] sm:$0xff] %v2549_v35   ;;  %v2539_v37 = vpack.c.bf16 %v2905_v40, %v2903_v61  ;;  %v2114_v62 = vadd.f32 %v2905_v40, %v2903_v61  ;;  %v2128_v45 = vmul.f32 %v2905_v40, %v2905_v40 }
 0x19a   : > { %2559 = vst [vmem:[%s285_s26 + $0x8] sm:$0xff] %v2544_v43  }
 0x19b   : > { %2540 = vst [vmem:[%s285_s26] sm:$0xff] %v2539_v37   ;;  %v2115_v50 = vadd.f32 %v2902_v9, %v2114_v62  ;;  %v2135_v53 = vadd.f32 %v2128_v45, %v2127_v44 }
 0x19d   : > { %v2136_v4 = vadd.f32 %v2135_v53, %v2129_v20  ;;  %v2116_v58 = vadd.f32 %v2904_v36, %v2115_v50 }
 0x19f   : > { %v2117_v19 = vadd.f32 %v2909_v13, %v2116_v58  ;;  %v2137_v1 = vadd.f32 %v2136_v4, %v2130_v57 }
 0x1a1   : > { %v2118_v7 = vadd.f32 %v2913_v33, %v2117_v19  ;;  %v2138_v51 = vadd.f32 %v2137_v1, %v2131_v0 }
 0x1a3   : > { %v2119_v2 = vadd.f32 %v2907_v46, %v2118_v7  ;;  %v2139_v6 = vadd.f32 %v2138_v51, %v2132_v18 }
 0x1a5   : > { %v2120_v12 = vadd.f32 %v2911_v55, %v2119_v2  ;;  %v2140_v23 = vadd.f32 %v2139_v6, %v2133_v15 }
 0x1a7   : > { %v2121_v63 = vrot.slane %v2120_v12, 4  ;;  %v2141_v14 = vadd.f32 %v2140_v23, %v2134_v11 }
 0x1a9   : > { %v2122_v10 = vadd.f32 %v2121_v63, %v2120_v12  ;;  %v2142_v47 = vrot.slane %v2141_v14, 4 }
 0x1ab   : > { %v2123_v60 = vrot.slane %v2122_v10, 2  ;;  %v2143_v16 = vadd.f32 %v2142_v47, %v2141_v14 }
 0x1ad   : > { %v2124_v49 = vadd.f32 %v2123_v60, %v2122_v10  ;;  %v2144_v25 = vrot.slane %v2143_v16, 2 }
 0x1af   : > { %v2125_v34 = vrot.slane %v2124_v49, 1  ;;  %v2145_v3 = vadd.f32 %v2144_v25, %v2143_v16 }
 0x1b1   : > { %v2146_v32 = vrot.slane %v2145_v3, 1  ;;  %v2126_v39 = vadd.f32 %v2125_v34, %v2124_v49 }
 0x1b3   : > { %v2147_v52 = vadd.f32 %v2146_v32, %v2145_v3 }
 0x1b5   : > { %v2149_v38 = vsel %vm491_vm2, %v2126_v39, %v2147_v52 }
 0x1b6   : > { %2150 = vst [vmem:[%s290_s30] sm:$0x3] %v2149_v38 }
 0x1b7 PF: > { %s18_s24 = sadd.s32 1, %s3056_s24  }
 0x1b8   : > { %p15_p5 = scmp.ge.s32.totalorder %s18_s24, 4  }
 0x1ba   :  { %17 = sbr.rel (!%p15_p5) target bundleno = 1 (0x1), region = 95 }

</bundles_post_ra>
